<compile_context>
chip_gen: v7x
topology: tpu7x:2x2x1
jax: 0.10.0
libtpu: 0.0.40
codegen_flags: <defaults>
</compile_context>

<pallas_src>
import functools

import jax
import jax.numpy as jnp
from jax.experimental import pallas as pl
from jax.experimental.pallas import tpu as pltpu

_HIDDEN = 512
_COMPUTE_DTYPE = jnp.bfloat16


def _mlp_kernel(x_ref, xr_ref, w_in_ref, b_in_ref, w_raw_ref, b_raw_ref,
                w_out1_ref, w_out2_ref, b_out_ref, o_ref, *, mode):
    """All refs are 2-D VMEM tiles; the independent column axis sits on lanes.

      x_ref:  (seq_len,  T)    w_in_ref:  (512, seq_len)   b_in_ref:  (512, 1)
      xr_ref: (seq_raw,  T)    w_raw_ref: (512, seq_raw)   b_raw_ref: (512, 1)
      w_out{1,2}_ref: (pred_len, 512)                      b_out_ref: (pred_len, 1)
      o_ref:  (pred_len, T)
    """
    # In-kernel bf16 cast (VPU work hidden under MXU); f32 accumulation.
    x = x_ref[...].astype(w_in_ref.dtype)
    xr = xr_ref[...].astype(w_raw_ref.dtype)

    h1 = jnp.dot(w_in_ref[...], x,
                 preferred_element_type=jnp.float32) + b_in_ref[...]
    h2 = jnp.dot(w_raw_ref[...], xr,
                 preferred_element_type=jnp.float32) + b_raw_ref[...]

    if mode == 'std':                      # nn.ReLU
        h1 = jnp.maximum(h1, 0.0)
        h2 = jnp.maximum(h2, 0.0)
    else:                                  # nn.Tanh (EUP slot)
        h1 = jnp.tanh(h1)
        h2 = jnp.tanh(h2)

    h1 = h1.astype(w_out1_ref.dtype)
    h2 = h2.astype(w_out2_ref.dtype)

    # cat([h1, h2], 0) contracted against W_out == W_out[:, :512]@h1 + W_out[:, 512:]@h2
    out = (jnp.dot(w_out1_ref[...], h1, preferred_element_type=jnp.float32)
           + jnp.dot(w_out2_ref[...], h2, preferred_element_type=jnp.float32)
           + b_out_ref[...])
    if mode == 'std':                      # final nn.ReLU ('std') / Identity otherwise
        out = jnp.maximum(out, 0.0)

    o_ref[...] = out.astype(o_ref.dtype)


def prepare_params(params, compute_dtype=_COMPUTE_DTYPE):
    """One-time weight prep (hoisted out of the per-call path): split W_out,
    cast matmul operands to bf16, keep biases as f32 broadcastable columns."""
    w_out = params['w_out']
    assert w_out.shape[1] == 2 * _HIDDEN, "output Linear expects 1024 inputs"
    return dict(
        w_in=params['w_in'].astype(compute_dtype),          # (512, seq_len)
        w_raw=params['w_raw'].astype(compute_dtype),         # (512, seq_raw)
        w_out1=w_out[:, :_HIDDEN].astype(compute_dtype),     # (pred_len, 512)
        w_out2=w_out[:, _HIDDEN:].astype(compute_dtype),     # (pred_len, 512)
        b_in=params['b_in'].astype(jnp.float32).reshape(_HIDDEN, 1),
        b_raw=params['b_raw'].astype(jnp.float32).reshape(_HIDDEN, 1),
        b_out=params['b_out'].astype(jnp.float32).reshape(-1, 1),
    )


def _per_lane_tile_bytes(seq_len, seq_raw, pred_len):
    # double-buffered f32 input/output tiles + f32/bf16 hidden intermediates, per lane
    return 2 * 4 * (seq_len + seq_raw + pred_len) + 2 * (4 + 2) * _HIDDEN


def _pick_tile(n, per_lane_bytes, budget=28 << 20):
    """Largest lane-dense tile (multiple of 128) that divides n and fits VMEM."""
    for cand in (512, 256, 128):
        if n % cand == 0 and cand * per_lane_bytes <= budget:
            return cand
    return n


def _weight_specs(seq_len, seq_raw, pred_len, grid_ndim):
    # Constant index maps: weights/biases are DMA'd once and stay VMEM-resident.
    const = (lambda n: (0, 0)) if grid_ndim == 1 else (lambda b, c: (0, 0))
    return [
        pl.BlockSpec((_HIDDEN, seq_len), const),     # W_in
        pl.BlockSpec((_HIDDEN, 1), const),           # b_in
        pl.BlockSpec((_HIDDEN, seq_raw), const),     # W_raw
        pl.BlockSpec((_HIDDEN, 1), const),           # b_raw
        pl.BlockSpec((pred_len, _HIDDEN), const),    # W_out[:, :512]
        pl.BlockSpec((pred_len, _HIDDEN), const),    # W_out[:, 512:]
        pl.BlockSpec((pred_len, 1), const),          # b_out
    ]


def _cost_and_vmem(B, C, seq_len, seq_raw, pred_len, tile, mode, operands):
    flops = 2 * B * C * _HIDDEN * (seq_len + seq_raw + 2 * pred_len)
    transcendentals = 0 if mode == 'std' else 2 * B * C * _HIDDEN
    bytes_accessed = (sum(int(a.size) * a.dtype.itemsize for a in operands)
                      + B * pred_len * C * 4)
    cost = pl.CostEstimate(flops=flops, transcendentals=transcendentals,
                           bytes_accessed=bytes_accessed)
    weight_bytes = sum(int(a.size) * a.dtype.itemsize for a in operands[2:])
    need = (2 * weight_bytes
            + tile * _per_lane_tile_bytes(seq_len, seq_raw, pred_len)
            + (4 << 20))
    vmem_limit = int(min(64 << 20, max(32 << 20, need)))
    return cost, vmem_limit


def mlp_pallas(x, x_raw, prepared, *, mode='std'):
    """x: (B, seq_len, C);  x_raw: (B, seq_len*period_len, C).
       Returns (B, pred_len, C) f32, matching the PyTorch module."""
    B, seq_len, C = x.shape
    _, seq_raw, _ = x_raw.shape
    pred_len = prepared['w_out1'].shape[0]

    weights = (prepared['w_in'], prepared['b_in'],
               prepared['w_raw'], prepared['b_raw'],
               prepared['w_out1'], prepared['w_out2'], prepared['b_out'])
    kernel = functools.partial(_mlp_kernel, mode=mode)
    per_lane = _per_lane_tile_bytes(seq_len, seq_raw, pred_len)

    if C < 128:
        # ---- narrow-channel path: fold batch into the lane axis ------------
        N = B * C
        tn = _pick_tile(N, per_lane)
        xt = jnp.transpose(x, (1, 0, 2)).reshape(seq_len, N)
        xrt = jnp.transpose(x_raw, (1, 0, 2)).reshape(seq_raw, N)
        operands = (xt, xrt) + weights
        cost, vmem_limit = _cost_and_vmem(B, C, seq_len, seq_raw, pred_len,
                                          tn, mode, operands)
        in_specs = [pl.BlockSpec((seq_len, tn), lambda n: (0, n)),
                    pl.BlockSpec((seq_raw, tn), lambda n: (0, n)),
                    *_weight_specs(seq_len, seq_raw, pred_len, 1)]
        out = pl.pallas_call(
            kernel,
            out_shape=jax.ShapeDtypeStruct((pred_len, N), jnp.float32),
            grid=(N // tn,),
            in_specs=in_specs,
            out_specs=pl.BlockSpec((pred_len, tn), lambda n: (0, n)),
            compiler_params=pltpu.CompilerParams(
                dimension_semantics=("parallel",),
                vmem_limit_bytes=vmem_limit),
            cost_estimate=cost,
        )(*operands)
        return jnp.transpose(out.reshape(pred_len, B, C), (1, 0, 2))

    # ---- wide-channel path: tile (batch, channel), native layout ------------
    tc = _pick_tile(C, per_lane)
    operands = (x, x_raw) + weights
    cost, vmem_limit = _cost_and_vmem(B, C, seq_len, seq_raw, pred_len,
                                      tc, mode, operands)
    in_specs = [pl.BlockSpec((None, seq_len, tc), lambda b, c: (b, 0, c)),
                pl.BlockSpec((None, seq_raw, tc), lambda b, c: (b, 0, c)),
                *_weight_specs(seq_len, seq_raw, pred_len, 2)]
    out_spec = pl.BlockSpec((None, pred_len, tc), lambda b, c: (b, 0, c))
    return pl.pallas_call(
        kernel,
        out_shape=jax.ShapeDtypeStruct((B, pred_len, C), jnp.float32),
        grid=(B, C // tc),
        in_specs=in_specs,
        out_specs=out_spec,
        compiler_params=pltpu.CompilerParams(
            dimension_semantics=("parallel", "parallel"),
            vmem_limit_bytes=vmem_limit),
        cost_estimate=cost,
    )(*operands)


def _reference(x, x_raw, params, *, mode='std'):
    """Pure-JAX f32 reference mirroring the PyTorch forward exactly."""
    xt = jnp.transpose(x, (0, 2, 1))
    xrt = jnp.transpose(x_raw, (0, 2, 1))
    h1 = xt @ params['w_in'].T + params['b_in']
    h2 = xrt @ params['w_raw'].T + params['b_raw']
    h = jnp.concatenate([h1, h2], axis=-1)
    h = jnp.maximum(h, 0.0) if mode == 'std' else jnp.tanh(h)
    o = h @ params['w_out'].T + params['b_out']
    if mode == 'std':
        o = jnp.maximum(o, 0.0)
    return jnp.transpose(o, (0, 2, 1))


def init_params(key, seq_len, period_len, pred_len):
    ks = jax.random.split(key, 6)
    seq_raw = seq_len * period_len

    def lin(kw, kb, fan_in, fan_out):
        bound = 1.0 / jnp.sqrt(fan_in)
        w = jax.random.uniform(kw, (fan_out, fan_in), jnp.float32, -bound, bound)
        b = jax.random.uniform(kb, (fan_out,), jnp.float32, -bound, bound)
        return w, b

    w_in, b_in = lin(ks[0], ks[1], seq_len, _HIDDEN)
    w_raw, b_raw = lin(ks[2], ks[3], seq_raw, _HIDDEN)
    w_out, b_out = lin(ks[4], ks[5], 2 * _HIDDEN, pred_len)
    return dict(w_in=w_in, b_in=b_in, w_raw=w_raw, b_raw=b_raw,
                w_out=w_out, b_out=b_out)


if __name__ == "__main__":
    key = jax.random.PRNGKey(0)
    k_x, k_xr, k_p = jax.random.split(key, 3)

    seq_len, period_len, pred_len = 8, 2, 8
    seq_raw = seq_len * period_len
    params = init_params(k_p, seq_len, period_len, pred_len)
    prepared = prepare_params(params)        # one-time bf16 weight prep + W_out split

    # (B, C) = (2, 4) exercises the folded narrow-channel path;
    # (2, 128) exercises the native-layout wide-channel path.
    for B, C in ((2, 4), (2, 128)):
        x = jax.random.normal(k_x, (B, seq_len, C), jnp.float32)
        x_raw = jax.random.normal(k_xr, (B, seq_raw, C), jnp.float32)
        for mode in ('std', 'mean'):
            out = jax.block_until_ready(mlp_pallas(x, x_raw, prepared, mode=mode))
            ref = _reference(x, x_raw, params, mode=mode)
            assert out.shape == (B, pred_len, C)
            # bf16 MXU compute vs f32 reference -> slightly looser tolerance
            assert jnp.allclose(out, ref, atol=5e-2, rtol=5e-2), \
                f"mismatch B={B} C={C} mode={mode}"

    print("KERNEL_OK")
</pallas_src>

<mosaic_0001>
module attributes {stable_mosaic.version = 11 : i64} {
  func.func @_mlp_kernel(%arg0: i32, %arg1: memref<8x8xf32, #tpu.memory_space<vmem>>, %arg2: memref<16x8xf32, #tpu.memory_space<vmem>>, %arg3: memref<512x8xbf16, #tpu.memory_space<vmem>>, %arg4: memref<512x1xf32, #tpu.memory_space<vmem>>, %arg5: memref<512x16xbf16, #tpu.memory_space<vmem>>, %arg6: memref<512x1xf32, #tpu.memory_space<vmem>>, %arg7: memref<8x512xbf16, #tpu.memory_space<vmem>>, %arg8: memref<8x512xbf16, #tpu.memory_space<vmem>>, %arg9: memref<8x1xf32, #tpu.memory_space<vmem>>, %arg10: memref<8x8xf32, #tpu.memory_space<vmem>>) attributes {dimension_semantics = [#tpu.dimension_semantics<parallel>], iteration_bounds = array<i64: 1>, scalar_prefetch = 0 : i64, scratch_operands = 0 : i64, tpu.core_type = #tpu.core_type<tc>, window_params = [{transform_indices = @transform_0, window_bounds = array<i64: 8, 8>}, {transform_indices = @transform_1, window_bounds = array<i64: 16, 8>}, {pipeline_mode = #tpu.pipeline_mode<synchronous>, transform_indices = @transform_2, window_bounds = array<i64: 512, 8>}, {pipeline_mode = #tpu.pipeline_mode<synchronous>, transform_indices = @transform_3, window_bounds = array<i64: 512, 1>}, {pipeline_mode = #tpu.pipeline_mode<synchronous>, transform_indices = @transform_4, window_bounds = array<i64: 512, 16>}, {pipeline_mode = #tpu.pipeline_mode<synchronous>, transform_indices = @transform_5, window_bounds = array<i64: 512, 1>}, {pipeline_mode = #tpu.pipeline_mode<synchronous>, transform_indices = @transform_6, window_bounds = array<i64: 8, 512>}, {pipeline_mode = #tpu.pipeline_mode<synchronous>, transform_indices = @transform_7, window_bounds = array<i64: 8, 512>}, {pipeline_mode = #tpu.pipeline_mode<synchronous>, transform_indices = @transform_8, window_bounds = array<i64: 8, 1>}, {transform_indices = @transform_9, window_bounds = array<i64: 8, 8>}]} {
    %c0 = arith.constant 0 : index
    %c0_0 = arith.constant 0 : index
    %0 = vector.load %arg1[%c0, %c0_0] : memref<8x8xf32, #tpu.memory_space<vmem>>, vector<8x8xf32>
    %1 = arith.truncf %0 : vector<8x8xf32> to vector<8x8xbf16>
    %c0_1 = arith.constant 0 : index
    %c0_2 = arith.constant 0 : index
    %2 = vector.load %arg2[%c0_1, %c0_2] : memref<16x8xf32, #tpu.memory_space<vmem>>, vector<16x8xf32>
    %3 = arith.truncf %2 : vector<16x8xf32> to vector<16x8xbf16>
    %c0_3 = arith.constant 0 : index
    %c0_4 = arith.constant 0 : index
    %4 = vector.load %arg3[%c0_3, %c0_4] : memref<512x8xbf16, #tpu.memory_space<vmem>>, vector<512x8xbf16>
    %cst = arith.constant dense<0.000000e+00> : vector<512x8xf32>
    %5 = tpu.matmul %4, %1, %cst {dimension_numbers = #tpu.dot_dimension_numbers<[1], [0], [0], [1], [0, 0, 1, 1], [], []>} : vector<512x8xbf16>, vector<8x8xbf16>, vector<512x8xf32> -> vector<512x8xf32>
    %c0_5 = arith.constant 0 : index
    %c0_6 = arith.constant 0 : index
    %6 = vector.load %arg4[%c0_5, %c0_6] : memref<512x1xf32, #tpu.memory_space<vmem>>, vector<512x1xf32>
    %7 = vector.broadcast %6 : vector<512x1xf32> to vector<512x8xf32>
    %8 = arith.addf %5, %7 : vector<512x8xf32>
    %c0_7 = arith.constant 0 : index
    %c0_8 = arith.constant 0 : index
    %9 = vector.load %arg5[%c0_7, %c0_8] : memref<512x16xbf16, #tpu.memory_space<vmem>>, vector<512x16xbf16>
    %cst_9 = arith.constant dense<0.000000e+00> : vector<512x8xf32>
    %10 = tpu.matmul %9, %3, %cst_9 {dimension_numbers = #tpu.dot_dimension_numbers<[1], [0], [0], [1], [0, 0, 1, 1], [], []>} : vector<512x16xbf16>, vector<16x8xbf16>, vector<512x8xf32> -> vector<512x8xf32>
    %c0_10 = arith.constant 0 : index
    %c0_11 = arith.constant 0 : index
    %11 = vector.load %arg6[%c0_10, %c0_11] : memref<512x1xf32, #tpu.memory_space<vmem>>, vector<512x1xf32>
    %12 = vector.broadcast %11 : vector<512x1xf32> to vector<512x8xf32>
    %13 = arith.addf %10, %12 : vector<512x8xf32>
    %cst_12 = arith.constant 0.000000e+00 : f32
    %14 = vector.broadcast %cst_12 : f32 to vector<512x8xf32>
    %15 = arith.maximumf %8, %14 : vector<512x8xf32>
    %cst_13 = arith.constant 0.000000e+00 : f32
    %16 = vector.broadcast %cst_13 : f32 to vector<512x8xf32>
    %17 = arith.maximumf %13, %16 : vector<512x8xf32>
    %18 = arith.truncf %15 : vector<512x8xf32> to vector<512x8xbf16>
    %19 = arith.truncf %17 : vector<512x8xf32> to vector<512x8xbf16>
    %c0_14 = arith.constant 0 : index
    %c0_15 = arith.constant 0 : index
    %20 = vector.load %arg7[%c0_14, %c0_15] : memref<8x512xbf16, #tpu.memory_space<vmem>>, vector<8x512xbf16>
    %cst_16 = arith.constant dense<0.000000e+00> : vector<8x8xf32>
    %21 = tpu.matmul %20, %18, %cst_16 {dimension_numbers = #tpu.dot_dimension_numbers<[1], [0], [0], [1], [0, 0, 1, 1], [], []>} : vector<8x512xbf16>, vector<512x8xbf16>, vector<8x8xf32> -> vector<8x8xf32>
    %c0_17 = arith.constant 0 : index
    %c0_18 = arith.constant 0 : index
    %22 = vector.load %arg8[%c0_17, %c0_18] : memref<8x512xbf16, #tpu.memory_space<vmem>>, vector<8x512xbf16>
    %cst_19 = arith.constant dense<0.000000e+00> : vector<8x8xf32>
    %23 = tpu.matmul %22, %19, %cst_19 {dimension_numbers = #tpu.dot_dimension_numbers<[1], [0], [0], [1], [0, 0, 1, 1], [], []>} : vector<8x512xbf16>, vector<512x8xbf16>, vector<8x8xf32> -> vector<8x8xf32>
    %24 = arith.addf %21, %23 : vector<8x8xf32>
    %c0_20 = arith.constant 0 : index
    %c0_21 = arith.constant 0 : index
    %25 = vector.load %arg9[%c0_20, %c0_21] : memref<8x1xf32, #tpu.memory_space<vmem>>, vector<8x1xf32>
    %26 = vector.broadcast %25 : vector<8x1xf32> to vector<8x8xf32>
    %27 = arith.addf %24, %26 : vector<8x8xf32>
    %cst_22 = arith.constant 0.000000e+00 : f32
    %28 = vector.broadcast %cst_22 : f32 to vector<8x8xf32>
    %29 = arith.maximumf %27, %28 : vector<8x8xf32>
    %c0_23 = arith.constant 0 : index
    %c0_24 = arith.constant 0 : index
    %30 = vector.load %arg10[%c0_23, %c0_24] : memref<8x8xf32, #tpu.memory_space<vmem>>, vector<8x8xf32>
    tpu.vector_store %arg10[%c0_23, %c0_24], %29 {strides = array<i32>} : memref<8x8xf32, #tpu.memory_space<vmem>>, vector<8x8xf32>,
    return
  }
  func.func @transform_0(%arg0: i32) -> (i32, i32) {
    %c0_i32 = arith.constant 0 : i32
    %c0_i32_0 = arith.constant 0 : i32
    return %c0_i32, %arg0 : i32, i32
  }
  func.func @transform_1(%arg0: i32) -> (i32, i32) {
    %c0_i32 = arith.constant 0 : i32
    %c0_i32_0 = arith.constant 0 : i32
    return %c0_i32, %arg0 : i32, i32
  }
  func.func @transform_2(%arg0: i32) -> (i32, i32) {
    %c0_i32 = arith.constant 0 : i32
    %c0_i32_0 = arith.constant 0 : i32
    %c0_i32_1 = arith.constant 0 : i32
    return %c0_i32, %c0_i32_0 : i32, i32
  }
  func.func @transform_3(%arg0: i32) -> (i32, i32) {
    %c0_i32 = arith.constant 0 : i32
    %c0_i32_0 = arith.constant 0 : i32
    %c0_i32_1 = arith.constant 0 : i32
    return %c0_i32, %c0_i32_0 : i32, i32
  }
  func.func @transform_4(%arg0: i32) -> (i32, i32) {
    %c0_i32 = arith.constant 0 : i32
    %c0_i32_0 = arith.constant 0 : i32
    %c0_i32_1 = arith.constant 0 : i32
    return %c0_i32, %c0_i32_0 : i32, i32
  }
  func.func @transform_5(%arg0: i32) -> (i32, i32) {
    %c0_i32 = arith.constant 0 : i32
    %c0_i32_0 = arith.constant 0 : i32
    %c0_i32_1 = arith.constant 0 : i32
    return %c0_i32, %c0_i32_0 : i32, i32
  }
  func.func @transform_6(%arg0: i32) -> (i32, i32) {
    %c0_i32 = arith.constant 0 : i32
    %c0_i32_0 = arith.constant 0 : i32
    %c0_i32_1 = arith.constant 0 : i32
    return %c0_i32, %c0_i32_0 : i32, i32
  }
  func.func @transform_7(%arg0: i32) -> (i32, i32) {
    %c0_i32 = arith.constant 0 : i32
    %c0_i32_0 = arith.constant 0 : i32
    %c0_i32_1 = arith.constant 0 : i32
    return %c0_i32, %c0_i32_0 : i32, i32
  }
  func.func @transform_8(%arg0: i32) -> (i32, i32) {
    %c0_i32 = arith.constant 0 : i32
    %c0_i32_0 = arith.constant 0 : i32
    %c0_i32_1 = arith.constant 0 : i32
    return %c0_i32, %c0_i32_0 : i32, i32
  }
  func.func @transform_9(%arg0: i32) -> (i32, i32) {
    %c0_i32 = arith.constant 0 : i32
    %c0_i32_0 = arith.constant 0 : i32
    return %c0_i32, %arg0 : i32, i32
  }
}

</mosaic_0001>

<bundles_post_ra>
// kernel: tpu_custom_call.1
= control target key start
LH: loop header
LB: loop body
LE: loop exit
PB: predicated region body
PF: predicated region fallthrough
CT: control target
= control target key end

     0   :  { %vm744_vm0 = vcmask 1043456   ;;  %v2962_v3 = vmov 0   ;;  %vm1645_vm1 = vcmask 130048   ;;  %vm647_vm2 = vcmask 64512   ;;  %s4147_s0 = inlined_call_operand.vmem [shape: f32[8,8], index: 0, kind: input, shape index: {}]   ;;  %s4148_s1 = inlined_call_operand.vmem [shape: f32[16,8], index: 1, kind: input, shape index: {}]   ;;  %s4149_s2 = inlined_call_operand.vmem [shape: bf16[512,8], index: 2, kind: input, shape index: {}]   ;;  %s4150_s3 = inlined_call_operand.vmem [shape: f32[512,1], index: 3, kind: input, shape index: {}]   ;;  %s4151_s4 = inlined_call_operand.vmem [shape: bf16[512,16], index: 4, kind: input, shape index: {}]   ;;  %s4152_s5 = inlined_call_operand.vmem [shape: f32[512,1], index: 5, kind: input, shape index: {}]   ;;  %s4153_s6 = inlined_call_operand.vmem [shape: bf16[8,512], index: 6, kind: input, shape index: {}]   ;;  %s4154_s7 = inlined_call_operand.vmem [shape: bf16[8,512], index: 7, kind: input, shape index: {}]   ;;  %s4155_s8 = inlined_call_operand.vmem [shape: f32[8,1], index: 8, kind: input, shape index: {}]   ;;  %s4156_s9 = inlined_call_operand.hbm [shape: f32[8,8], index: 9, kind: output, shape index: {}]  }
   0x1   :  { %v105_v0 = vld [vmem:[%s4150_s3 + $0x10] sm:$0xff]  ;;  %v103_v1 = vld [vmem:[%s4150_s3] sm:$0xff]  ;;  %2864 = vset.pattern.permute.xlu1 %v2962_v3  ;;  %2863 = vset.pattern.permute.xlu0 %v2962_v3  ;;  %v37_v6 = vld [vmem:[%s4148_s1 + $0x8] sm:$0xff] }
   0x2   :  { %v34_v2 = vld [vmem:[%s4147_s0] sm:$0xff]  ;;  %179 = vperm.xlu1 %2864, %v105_v0   ;;  %169 = vperm.xlu0 %2863, %v103_v1   ;;  %v106_v9 = vld [vmem:[%s4150_s3 + $0x18] sm:$0xff]  ;;  %v104_v11 = vld [vmem:[%s4150_s3 + $0x8] sm:$0xff] }
   0x3   :  { %v35_v4 = vpack.c.bf16 %v34_v2, %v34_v2  ;;  %v36_v5 = vld [vmem:[%s4148_s1] sm:$0xff]  ;;  %v2867_v13 = vld [vmem:[%s4149_s2 + $0x8] sm:$0xff]   ;;  %v2869_v17 = vld [vmem:[%s4149_s2 + $0x10] sm:$0xff]  }
   0x4   :  { %v38_v7 = vpack.c.bf16 %v37_v6, %v36_v5  ;;  %v2865_v8 = vld [vmem:[%s4151_s4] sm:$0xff]   ;;  %v2868_v14 = vld [vmem:[%s4151_s4 + $0x8] sm:$0xff]   ;;  %v2870_v18 = vld [vmem:[%s4151_s4 + $0x10] sm:$0xff]  }
   0x5   :  { %2860 = vmatprep.subr.msk.bf16.mxu0 %vm744_vm0, %v35_v4  ;;  %v746_v10 = vsel %vm744_vm0, %v35_v4, 0  ;;  %v2866_v12 = vld [vmem:[%s4149_s2] sm:$0xff]   ;;  %2796 = vmatprep.mubr.msk.bf16.mxu1 %vm1645_vm1, %v2865_v8  ;;  %v108_v15 = vld [vmem:[%s4150_s3 + $0x28] sm:$0xff]  ;;  %v110_v19 = vld [vmem:[%s4150_s3 + $0x38] sm:$0xff] }
   0x6   :  { %2794 = vmatprep.subr.bf16.mxu1 %v38_v7  ;;  %2729 = vmatpush3.bf16.msra.mxu0 %v746_v10  ;;  %v107_v16 = vld [vmem:[%s4150_s3 + $0x20] sm:$0xff]  ;;  %v109_v20 = vld [vmem:[%s4150_s3 + $0x30] sm:$0xff]  ;;  %v2871_v21 = vld [vmem:[%s4149_s2 + $0x18] sm:$0xff]  }
   0x7   :  { %2795 = vmatpush3.bf16.msra.mxu1 %v38_v7  ;;  %184 = vperm.xlu1 %2864, %v106_v9   ;;  %v2872_v22 = vld [vmem:[%s4151_s4 + $0x18] sm:$0xff]   ;;  %v112_v23 = vld [vmem:[%s4150_s3 + $0x48] sm:$0xff]  ;;  %v2873_v24 = vld [vmem:[%s4149_s2 + $0x20] sm:$0xff]  }
   0x8   :  { %174 = vperm.xlu0 %2863, %v104_v11   ;;  %2730 = vmatprep.mubr.msk.bf16.mxu0 %vm647_vm2, %v2866_v12  ;;  %v2874_v25 = vld [vmem:[%s4151_s4 + $0x20] sm:$0xff]   ;;  %v114_v27 = vld [vmem:[%s4150_s3 + $0x58] sm:$0xff]  ;;  %v113_v28 = vld [vmem:[%s4150_s3 + $0x50] sm:$0xff] }
   0x9   :  { %2731 = vmatmul.mubr.msk.bf16.vlgmr.msra.gmra.mrb[0].mxu0 %vm647_vm2, %v2867_v13  ;;  %v111_v26 = vld [vmem:[%s4150_s3 + $0x40] sm:$0xff]  ;;  %v2875_v29 = vld [vmem:[%s4149_s2 + $0x28] sm:$0xff]   ;;  %v2877_v31 = vld [vmem:[%s4149_s2 + $0x30] sm:$0xff]  }
   0xa   :  { %2797 = vmatmul.mubr.msk.bf16.vlgmr.msra.gmra.mrb[0].mxu1 %vm1645_vm1, %v2868_v14  ;;  %2734 = vmatprep.mubr.msk.bf16.mxu0 %vm647_vm2, %v2869_v17  ;;  %v2876_v30 = vld [vmem:[%s4151_s4 + $0x28] sm:$0xff]   ;;  %v2878_v32 = vld [vmem:[%s4151_s4 + $0x30] sm:$0xff]   ;;  %v115_v34 = vld [vmem:[%s4150_s3 + $0x60] sm:$0xff] }
   0xb   :  { %194 = vperm.xlu1 %2864, %v108_v15   ;;  %2800 = vmatprep.mubr.msk.bf16.mxu1 %vm1645_vm1, %v2870_v18  ;;  %v116_v33 = vld [vmem:[%s4150_s3 + $0x68] sm:$0xff]  ;;  %v118_v35 = vld [vmem:[%s4150_s3 + $0x78] sm:$0xff]  ;;  %v117_v36 = vld [vmem:[%s4150_s3 + $0x70] sm:$0xff] }
   0xc   :  { %189 = vperm.xlu0 %2863, %v107_v16   ;;  %v2879_v37 = vld [vmem:[%s4149_s2 + $0x38] sm:$0xff]   ;;  %v2881_v39 = vld [vmem:[%s4149_s2 + $0x40] sm:$0xff]   ;;  %v120_v41 = vld [vmem:[%s4150_s3 + $0x88] sm:$0xff] }
   0xd   :  { %v2880_v38 = vld [vmem:[%s4151_s4 + $0x38] sm:$0xff]   ;;  %v2882_v40 = vld [vmem:[%s4151_s4 + $0x40] sm:$0xff]   ;;  %v121_v44 = vld [vmem:[%s4150_s3 + $0x90] sm:$0xff] }
   0xe   :  { %v119_v42 = vld [vmem:[%s4150_s3 + $0x80] sm:$0xff]  ;;  %v122_v43 = vld [vmem:[%s4150_s3 + $0x98] sm:$0xff]  ;;  %v2883_v45 = vld [vmem:[%s4149_s2 + $0x48] sm:$0xff]  }
   0xf   :  { %204 = vperm.xlu1 %2864, %v110_v19   ;;  %v2884_v46 = vld [vmem:[%s4151_s4 + $0x48] sm:$0xff]   ;;  %v2885_v47 = vld [vmem:[%s4149_s2 + $0x50] sm:$0xff]   ;;  %v123_v50 = vld [vmem:[%s4150_s3 + $0xa0] sm:$0xff] }
  0x10   :  { %199 = vperm.xlu0 %2863, %v109_v20   ;;  %v2886_v48 = vld [vmem:[%s4151_s4 + $0x50] sm:$0xff]   ;;  %v124_v49 = vld [vmem:[%s4150_s3 + $0xa8] sm:$0xff]  ;;  %v126_v51 = vld [vmem:[%s4150_s3 + $0xb8] sm:$0xff] }
  0x11   :  { %2735 = vmatmul.mubr.msk.bf16.gmra.mrb[4].mxu0 %vm647_vm2, %v2871_v21  ;;  %v125_v52 = vld [vmem:[%s4150_s3 + $0xb0] sm:$0xff]  ;;  %v2887_v53 = vld [vmem:[%s4149_s2 + $0x58] sm:$0xff]   ;;  %v2889_v55 = vld [vmem:[%s4149_s2 + $0x60] sm:$0xff]  }
  0x12   :  { %2801 = vmatmul.mubr.msk.bf16.gmra.mrb[4].mxu1 %vm1645_vm1, %v2872_v22  ;;  %2738 = vmatprep.mubr.msk.bf16.mxu0 %vm647_vm2, %v2873_v24  ;;  %v2888_v54 = vld [vmem:[%s4151_s4 + $0x58] sm:$0xff]   ;;  %v2890_v56 = vld [vmem:[%s4151_s4 + $0x60] sm:$0xff]   ;;  %v128_v57 = vld [vmem:[%s4150_s3 + $0xc8] sm:$0xff] }
  0x13   :  { %2804 = vmatprep.mubr.msk.bf16.mxu1 %vm1645_vm1, %v2874_v25  ;;  %214 = vperm.xlu1 %2864, %v112_v23   ;;  %v127_v58 = vld [vmem:[%s4150_s3 + $0xc0] sm:$0xff]  ;;  %v130_v59 = vld [vmem:[%s4150_s3 + $0xd8] sm:$0xff]  ;;  %v129_v60 = vld [vmem:[%s4150_s3 + $0xd0] sm:$0xff] }
  0x14   :  { %209 = vperm.xlu0 %2863, %v111_v26   ;;  %v2891_v61 = vld [vmem:[%s4149_s2 + $0x68] sm:$0xff]   ;;  %v2893_v63 = vld [vmem:[%s4149_s2 + $0x70] sm:$0xff]   ;;  %v131_v2 = vld [vmem:[%s4150_s3 + $0xe0] sm:$0xff] }
  0x15   :  { %v2892_v62 = vld [vmem:[%s4151_s4 + $0x68] sm:$0xff]   ;;  %v2894_v0 = vld [vmem:[%s4151_s4 + $0x70] sm:$0xff]   ;;  %v134_v3 = vld [vmem:[%s4150_s3 + $0xf8] sm:$0xff] }
  0x16   :  { %v132_v1 = vld [vmem:[%s4150_s3 + $0xe8] sm:$0xff]  ;;  %v133_v4 = vld [vmem:[%s4150_s3 + $0xf0] sm:$0xff]  ;;  %v2895_v5 = vld [vmem:[%s4149_s2 + $0x78] sm:$0xff]  }
  0x17   :  { %224 = vperm.xlu1 %2864, %v114_v27   ;;  %v2896_v6 = vld [vmem:[%s4151_s4 + $0x78] sm:$0xff]   ;;  %v2897_v7 = vld [vmem:[%s4149_s2 + $0x80] sm:$0xff]   ;;  %v136_v9 = vld [vmem:[%s4150_s3 + $0x108] sm:$0xff] }
  0x18   :  { %219 = vperm.xlu0 %2863, %v113_v28   ;;  %v2898_v8 = vld [vmem:[%s4151_s4 + $0x80] sm:$0xff]   ;;  %v138_v11 = vld [vmem:[%s4150_s3 + $0x118] sm:$0xff]  ;;  %v137_v12 = vld [vmem:[%s4150_s3 + $0x110] sm:$0xff] }
  0x19   :  { %2739 = vmatmul.mubr.msk.bf16.gmra.mrb[8].mxu0 %vm647_vm2, %v2875_v29  ;;  %v135_v10 = vld [vmem:[%s4150_s3 + $0x100] sm:$0xff]  ;;  %v2899_v13 = vld [vmem:[%s4149_s2 + $0x88] sm:$0xff]   ;;  %v2901_v15 = vld [vmem:[%s4149_s2 + $0x90] sm:$0xff]  }
  0x1a   :  { %2805 = vmatmul.mubr.msk.bf16.gmra.mrb[8].mxu1 %vm1645_vm1, %v2876_v30  ;;  %2742 = vmatprep.mubr.msk.bf16.mxu0 %vm647_vm2, %v2877_v31  ;;  %v2900_v14 = vld [vmem:[%s4151_s4 + $0x88] sm:$0xff]   ;;  %v2902_v16 = vld [vmem:[%s4151_s4 + $0x90] sm:$0xff]   ;;  %v139_v18 = vld [vmem:[%s4150_s3 + $0x120] sm:$0xff] }
  0x1b   :  { %2808 = vmatprep.mubr.msk.bf16.mxu1 %vm1645_vm1, %v2878_v32  ;;  %234 = vperm.xlu1 %2864, %v116_v33   ;;  %v140_v17 = vld [vmem:[%s4150_s3 + $0x128] sm:$0xff]  ;;  %v142_v19 = vld [vmem:[%s4150_s3 + $0x138] sm:$0xff]  ;;  %v141_v20 = vld [vmem:[%s4150_s3 + $0x130] sm:$0xff] }
  0x1c   :  { %229 = vperm.xlu0 %2863, %v115_v34   ;;  %v2903_v21 = vld [vmem:[%s4149_s2 + $0x98] sm:$0xff]   ;;  %v2905_v23 = vld [vmem:[%s4151_s4 + $0xa0] sm:$0xff]   ;;  %v1118_v25 = vld [vmem:[%s4152_s5 + $0x88] sm:$0xff] }
  0x1d   :  { %v2904_v22 = vld [vmem:[%s4151_s4 + $0x98] sm:$0xff]   ;;  %v2911_v24 = vld [vmem:[%s4149_s2 + $0xa0] sm:$0xff]   ;;  %v1102_v27 = vld [vmem:[%s4152_s5 + $0x8] sm:$0xff] }
  0x1e   :  { %v1117_v26 = vld [vmem:[%s4152_s5 + $0x80] sm:$0xff]  ;;  %v2906_v29 = vld [vmem:[%s4151_s4 + $0xa8] sm:$0xff]   ;;  %v2907_v30 = vld [vmem:[%s4151_s4 + $0xb0] sm:$0xff]  }
  0x1f   :  { %244 = vperm.xlu1 %2864, %v118_v35   ;;  %v1101_v28 = vld [vmem:[%s4152_s5] sm:$0xff]  ;;  %v2912_v31 = vld [vmem:[%s4149_s2 + $0xa8] sm:$0xff]   ;;  %v2915_v32 = vld [vmem:[%s4149_s2 + $0xb0] sm:$0xff]  }
  0x20   :  { %239 = vperm.xlu0 %2863, %v117_v36   ;;  %v1150_v33 = vld [vmem:[%s4152_s5 + $0x188] sm:$0xff]  ;;  %v1149_v34 = vld [vmem:[%s4152_s5 + $0x180] sm:$0xff] }
  0x21   :  { %2743 = vmatmul.mubr.msk.bf16.gmra.mrb[12].mxu0 %vm647_vm2, %v2879_v37  ;;  %v1134_v35 = vld [vmem:[%s4152_s5 + $0x108] sm:$0xff]  ;;  %v1133_v36 = vld [vmem:[%s4152_s5 + $0x100] sm:$0xff]  ;;  %v2908_v37 = vld [vmem:[%s4151_s4 + $0xb8] sm:$0xff]  }
  0x22   :  { %2809 = vmatmul.mubr.msk.bf16.gmra.mrb[12].mxu1 %vm1645_vm1, %v2880_v38  ;;  %2746 = vmatprep.mubr.msk.bf16.mxu0 %vm647_vm2, %v2881_v39  ;;  %v2916_v38 = vld [vmem:[%s4149_s2 + $0xb8] sm:$0xff]   ;;  %v2909_v39 = vld [vmem:[%s4151_s4 + $0xc0] sm:$0xff]  }
  0x23   :  { %2812 = vmatprep.mubr.msk.bf16.mxu1 %vm1645_vm1, %v2882_v40  ;;  %254 = vperm.xlu1 %2864, %v120_v41   ;;  %v2919_v40 = vld [vmem:[%s4149_s2 + $0xc0] sm:$0xff]   ;;  %v1120_v41 = vld [vmem:[%s4152_s5 + $0x98] sm:$0xff] }
  0x24   :  { %249 = vperm.xlu0 %2863, %v119_v42   ;;  %v1119_v42 = vld [vmem:[%s4152_s5 + $0x90] sm:$0xff] }
  0x27   :  { %264 = vperm.xlu1 %2864, %v122_v43   ;;  %v1104_v43 = vld [vmem:[%s4152_s5 + $0x18] sm:$0xff] }
  0x28   :  { %259 = vperm.xlu0 %2863, %v121_v44   ;;  %v1103_v44 = vld [vmem:[%s4152_s5 + $0x10] sm:$0xff] }
  0x29   :  { %2747 = vmatmul.mubr.msk.bf16.gmra.mrb[16].mxu0 %vm647_vm2, %v2883_v45  ;;  %v2910_v45 = vld [vmem:[%s4151_s4 + $0xc8] sm:$0xff]  }
  0x2a   :  { %2813 = vmatmul.mubr.msk.bf16.gmra.mrb[16].mxu1 %vm1645_vm1, %v2884_v46  ;;  %2750 = vmatprep.mubr.msk.bf16.mxu0 %vm647_vm2, %v2885_v47  ;;  %v2920_v46 = vld [vmem:[%s4149_s2 + $0xc8] sm:$0xff]   ;;  %v2913_v47 = vld [vmem:[%s4151_s4 + $0xd0] sm:$0xff]  }
  0x2b   :  { %2816 = vmatprep.mubr.msk.bf16.mxu1 %vm1645_vm1, %v2886_v48  ;;  %274 = vperm.xlu1 %2864, %v124_v49   ;;  %v2923_v48 = vld [vmem:[%s4149_s2 + $0xd0] sm:$0xff]   ;;  %v1152_v49 = vld [vmem:[%s4152_s5 + $0x198] sm:$0xff] }
  0x2c   :  { %269 = vperm.xlu0 %2863, %v123_v50   ;;  %v1151_v50 = vld [vmem:[%s4152_s5 + $0x190] sm:$0xff] }
  0x2f   :  { %284 = vperm.xlu1 %2864, %v126_v51  }
  0x30   :  { %279 = vperm.xlu0 %2863, %v125_v52  }
  0x31   :  { %2751 = vmatmul.mubr.msk.bf16.gmra.mrb[20].mxu0 %vm647_vm2, %v2887_v53 }
  0x32   :  { %2817 = vmatmul.mubr.msk.bf16.gmra.mrb[20].mxu1 %vm1645_vm1, %v2888_v54  ;;  %2754 = vmatprep.mubr.msk.bf16.mxu0 %vm647_vm2, %v2889_v55 }
  0x33   :  { %2820 = vmatprep.mubr.msk.bf16.mxu1 %vm1645_vm1, %v2890_v56  ;;  %294 = vperm.xlu1 %2864, %v128_v57  }
  0x34   :  { %289 = vperm.xlu0 %2863, %v127_v58  }
  0x37   :  { %304 = vperm.xlu1 %2864, %v130_v59  }
  0x38   :  { %299 = vperm.xlu0 %2863, %v129_v60  }
  0x39   :  { %2755 = vmatmul.mubr.msk.bf16.gmra.mrb[24].mxu0 %vm647_vm2, %v2891_v61 }
  0x3a   :  { %2821 = vmatmul.mubr.msk.bf16.gmra.mrb[24].mxu1 %vm1645_vm1, %v2892_v62  ;;  %2758 = vmatprep.mubr.msk.bf16.mxu0 %vm647_vm2, %v2893_v63 }
  0x3b   :  { %2824 = vmatprep.mubr.msk.bf16.mxu1 %vm1645_vm1, %v2894_v0  ;;  %314 = vperm.xlu1 %2864, %v132_v1  }
  0x3c   :  { %309 = vperm.xlu0 %2863, %v131_v2  }
  0x3f   :  { %324 = vperm.xlu1 %2864, %v134_v3  }
  0x40   :  { %319 = vperm.xlu0 %2863, %v133_v4  }
  0x41   :  { %2759 = vmatmul.mubr.msk.bf16.gmra.mrb[28].mxu0 %vm647_vm2, %v2895_v5 }
  0x42   :  { %2825 = vmatmul.mubr.msk.bf16.gmra.mrb[28].mxu1 %vm1645_vm1, %v2896_v6  ;;  %2762 = vmatprep.mubr.msk.bf16.mxu0 %vm647_vm2, %v2897_v7 }
  0x43   :  { %2828 = vmatprep.mubr.msk.bf16.mxu1 %vm1645_vm1, %v2898_v8  ;;  %334 = vperm.xlu1 %2864, %v136_v9  }
  0x44   :  { %329 = vperm.xlu0 %2863, %v135_v10  }
  0x47   :  { %344 = vperm.xlu1 %2864, %v138_v11  }
  0x48   :  { %339 = vperm.xlu0 %2863, %v137_v12  }
  0x49   :  { %2763 = vmatmul.mubr.msk.bf16.gmra.mrb[32].mxu0 %vm647_vm2, %v2899_v13 }
  0x4a   :  { %2829 = vmatmul.mubr.msk.bf16.gmra.mrb[32].mxu1 %vm1645_vm1, %v2900_v14  ;;  %2766 = vmatprep.mubr.msk.bf16.mxu0 %vm647_vm2, %v2901_v15 }
  0x4b   :  { %2832 = vmatprep.mubr.msk.bf16.mxu1 %vm1645_vm1, %v2902_v16  ;;  %354 = vperm.xlu1 %2864, %v140_v17  }
  0x4c   :  { %349 = vperm.xlu0 %2863, %v139_v18  }
  0x4f   :  { %364 = vperm.xlu1 %2864, %v142_v19  }
  0x50   :  { %359 = vperm.xlu0 %2863, %v141_v20  }
  0x51   :  { %2767 = vmatmul.mubr.msk.bf16.gmra.mrb[36].mxu0 %vm647_vm2, %v2903_v21 }
  0x52   :  { %2833 = vmatmul.mubr.msk.bf16.gmra.mrb[36].mxu1 %vm1645_vm1, %v2904_v22  ;;  %2770 = vmatprep.mubr.msk.bf16.mxu0 %vm647_vm2, %v2911_v24 }
  0x53   :  { %2836 = vmatprep.mubr.msk.bf16.mxu1 %vm1645_vm1, %v2905_v23  ;;  %1252 = vperm.xlu1 %2864, %v1118_v25  }
  0x54   :  { %1247 = vperm.xlu0 %2863, %v1117_v26  }
  0x57   :  { %1172 = vperm.xlu1 %2864, %v1102_v27  }
  0x58   :  { %1167 = vperm.xlu0 %2863, %v1101_v28  }
  0x59   :  { %2771 = vmatmul.mubr.msk.bf16.gmra.mrb[40].mxu0 %vm647_vm2, %v2912_v31 }
  0x5a   :  { %2837 = vmatmul.mubr.msk.bf16.gmra.mrb[40].mxu1 %vm1645_vm1, %v2906_v29  ;;  %2774 = vmatprep.mubr.msk.bf16.mxu0 %vm647_vm2, %v2915_v32 }
  0x5b   :  { %2840 = vmatprep.mubr.msk.bf16.mxu1 %vm1645_vm1, %v2907_v30  ;;  %1412 = vperm.xlu1 %2864, %v1150_v33  }
  0x5c   :  { %1407 = vperm.xlu0 %2863, %v1149_v34  }
  0x5f   :  { %1332 = vperm.xlu1 %2864, %v1134_v35  }
  0x60   :  { %1327 = vperm.xlu0 %2863, %v1133_v36  }
  0x61   :  { %2775 = vmatmul.mubr.msk.bf16.gmra.mrb[44].mxu0 %vm647_vm2, %v2916_v38 }
  0x62   :  { %2841 = vmatmul.mubr.msk.bf16.gmra.mrb[44].mxu1 %vm1645_vm1, %v2908_v37  ;;  %2778 = vmatprep.mubr.msk.bf16.mxu0 %vm647_vm2, %v2919_v40 }
  0x63   :  { %2844 = vmatprep.mubr.msk.bf16.mxu1 %vm1645_vm1, %v2909_v39  ;;  %1262 = vperm.xlu1 %2864, %v1120_v41  }
  0x64   :  { %1257 = vperm.xlu0 %2863, %v1119_v42  }
  0x67   :  { %1182 = vperm.xlu1 %2864, %v1104_v43  }
  0x68   :  { %1177 = vperm.xlu0 %2863, %v1103_v44  }
  0x69   :  { %14 = vsyncpa [#allocation3], 0  ;;  %2779 = vmatmul.mubr.msk.bf16.gmra.mrb[48].mxu0 %vm647_vm2, %v2920_v46  ;;  %v1136_v51 = vld [vmem:[%s4152_s5 + $0x118] sm:$0xff]  ;;  %v1135_v52 = vld [vmem:[%s4152_s5 + $0x110] sm:$0xff] }
  0x6a   :  { %2845 = vmatmul.mubr.msk.bf16.gmra.mrb[48].mxu1 %vm1645_vm1, %v2910_v45  ;;  %2782 = vmatprep.mubr.msk.bf16.mxu0 %vm647_vm2, %v2923_v48  ;;  %v2914_v53 = vld [vmem:[%s4151_s4 + $0xd8] sm:$0xff]   ;;  %v2917_v55 = vld [vmem:[%s4151_s4 + $0xe0] sm:$0xff]   ;;  %v1122_v57 = vld [vmem:[%s4152_s5 + $0xa8] sm:$0xff] }
  0x6b   :  { %2848 = vmatprep.mubr.msk.bf16.mxu1 %vm1645_vm1, %v2913_v47  ;;  %1422 = vperm.xlu1 %2864, %v1152_v49   ;;  %v2924_v54 = vld [vmem:[%s4149_s2 + $0xd8] sm:$0xff]   ;;  %v2925_v56 = vld [vmem:[%s4149_s2 + $0xe0] sm:$0xff]   ;;  %v1106_v59 = vld [vmem:[%s4152_s5 + $0x28] sm:$0xff] }
  0x6c   :  { %1417 = vperm.xlu0 %2863, %v1151_v50   ;;  %v1121_v58 = vld [vmem:[%s4152_s5 + $0xa0] sm:$0xff]  ;;  %v2918_v61 = vld [vmem:[%s4151_s4 + $0xe8] sm:$0xff]   ;;  %v2921_v63 = vld [vmem:[%s4151_s4 + $0xf0] sm:$0xff]  }
  0x6d   :  { %v1105_v60 = vld [vmem:[%s4152_s5 + $0x20] sm:$0xff]  ;;  %v2926_v62 = vld [vmem:[%s4149_s2 + $0xe8] sm:$0xff]   ;;  %v2927_v0 = vld [vmem:[%s4149_s2 + $0xf0] sm:$0xff]  }
  0x6e   :  { %v1154_v1 = vld [vmem:[%s4152_s5 + $0x1a8] sm:$0xff]  ;;  %v1153_v2 = vld [vmem:[%s4152_s5 + $0x1a0] sm:$0xff]  ;;  %v2922_v5 = vld [vmem:[%s4151_s4 + $0xf8] sm:$0xff]  }
  0x6f   :  { %1342 = vperm.xlu1 %2864, %v1136_v51   ;;  %v1138_v3 = vld [vmem:[%s4152_s5 + $0x128] sm:$0xff]  ;;  %v1137_v4 = vld [vmem:[%s4152_s5 + $0x120] sm:$0xff]  ;;  %v2928_v6 = vld [vmem:[%s4149_s2 + $0xf8] sm:$0xff]  }
  0x70   :  { %1337 = vperm.xlu0 %2863, %v1135_v52   ;;  %v1124_v7 = vld [vmem:[%s4152_s5 + $0xb8] sm:$0xff]  ;;  %v1123_v8 = vld [vmem:[%s4152_s5 + $0xb0] sm:$0xff]  ;;  %v1126_v23 = vld [vmem:[%s4152_s5 + $0xc8] sm:$0xff] }
  0x71   :  { %2783 = vmatmul.mubr.msk.bf16.gmra.mrb[52].mxu0 %vm647_vm2, %v2924_v54  ;;  %v1108_v11 = vld [vmem:[%s4152_s5 + $0x38] sm:$0xff]  ;;  %v1107_v12 = vld [vmem:[%s4152_s5 + $0x30] sm:$0xff]  ;;  %v1125_v24 = vld [vmem:[%s4152_s5 + $0xc0] sm:$0xff] }
  0x72   :  { %2849 = vmatmul.mubr.msk.bf16.gmra.mrb[52].mxu1 %vm1645_vm1, %v2914_v53  ;;  %2786 = vmatprep.mubr.msk.bf16.mxu0 %vm647_vm2, %v2925_v56  ;;  %v1156_v15 = vld [vmem:[%s4152_s5 + $0x1b8] sm:$0xff]  ;;  %v1155_v16 = vld [vmem:[%s4152_s5 + $0x1b0] sm:$0xff]  ;;  %v1110_v27 = vld [vmem:[%s4152_s5 + $0x48] sm:$0xff] }
  0x73   :  { %2852 = vmatprep.mubr.msk.bf16.mxu1 %vm1645_vm1, %v2917_v55  ;;  %1272 = vperm.xlu1 %2864, %v1122_v57   ;;  %v1140_v19 = vld [vmem:[%s4152_s5 + $0x138] sm:$0xff]  ;;  %v1139_v20 = vld [vmem:[%s4152_s5 + $0x130] sm:$0xff]  ;;  %v1109_v28 = vld [vmem:[%s4152_s5 + $0x40] sm:$0xff] }
  0x74   :  { %1267 = vperm.xlu0 %2863, %v1121_v58   ;;  %v1158_v31 = vld [vmem:[%s4152_s5 + $0x1c8] sm:$0xff]  ;;  %v1157_v32 = vld [vmem:[%s4152_s5 + $0x1c0] sm:$0xff]  ;;  %v1128_v39 = vld [vmem:[%s4152_s5 + $0xd8] sm:$0xff] }
  0x75   :  { %v1142_v35 = vld [vmem:[%s4152_s5 + $0x148] sm:$0xff]  ;;  %v1141_v36 = vld [vmem:[%s4152_s5 + $0x140] sm:$0xff]  ;;  %v1127_v40 = vld [vmem:[%s4152_s5 + $0xd0] sm:$0xff] }
  0x76   :  { %v1112_v43 = vld [vmem:[%s4152_s5 + $0x58] sm:$0xff]  ;;  %v1111_v44 = vld [vmem:[%s4152_s5 + $0x50] sm:$0xff]  ;;  %v1130_v55 = vld [vmem:[%s4152_s5 + $0xe8] sm:$0xff] }
  0x77   :  { %1192 = vperm.xlu1 %2864, %v1106_v59   ;;  %v1160_v47 = vld [vmem:[%s4152_s5 + $0x1d8] sm:$0xff]  ;;  %v1159_v48 = vld [vmem:[%s4152_s5 + $0x1d0] sm:$0xff]  ;;  %v1129_v56 = vld [vmem:[%s4152_s5 + $0xe0] sm:$0xff] }
  0x78   :  { %1187 = vperm.xlu0 %2863, %v1105_v60   ;;  %v1144_v51 = vld [vmem:[%s4152_s5 + $0x158] sm:$0xff]  ;;  %v1143_v52 = vld [vmem:[%s4152_s5 + $0x150] sm:$0xff]  ;;  %v1114_v59 = vld [vmem:[%s4152_s5 + $0x68] sm:$0xff] }
  0x79   :  { %2787 = vmatmul.mubr.msk.bf16.gmra.mrb[56].mxu0 %vm647_vm2, %v2926_v62  ;;  %v1113_v60 = vld [vmem:[%s4152_s5 + $0x60] sm:$0xff] }
  0x7a   :  { %2853 = vmatmul.mubr.msk.bf16.gmra.mrb[56].mxu1 %vm1645_vm1, %v2918_v61  ;;  %2790 = vmatprep.mubr.msk.bf16.mxu0 %vm647_vm2, %v2927_v0  ;;  %v1161_v0 = vld [vmem:[%s4152_s5 + $0x1e0] sm:$0xff] }
  0x7b   :  { %2856 = vmatprep.mubr.msk.bf16.mxu1 %vm1645_vm1, %v2921_v63  ;;  %1432 = vperm.xlu1 %2864, %v1154_v1   ;;  %v1162_v63 = vld [vmem:[%s4152_s5 + $0x1e8] sm:$0xff] }
  0x7c   :  { %1427 = vperm.xlu0 %2863, %v1153_v2  }
  0x7f   :  { %1352 = vperm.xlu1 %2864, %v1138_v3   ;;  %v1146_v3 = vld [vmem:[%s4152_s5 + $0x168] sm:$0xff] }
  0x80   :  { %1347 = vperm.xlu0 %2863, %v1137_v4   ;;  %v1145_v4 = vld [vmem:[%s4152_s5 + $0x160] sm:$0xff] }
  0x81   :  { %2791 = vmatmul.mubr.msk.bf16.gmra.mrb[60].mxu0 %vm647_vm2, %v2928_v6  ;;  %v3477_v9 = vpop.permute.xlu1 %179  ;;  %v3479_v10 = vpop.permute.xlu0 %169 }
  0x82   :  { %2857 = vmatmul.mubr.msk.bf16.gmra.mrb[60].mxu1 %vm1645_vm1, %v2922_v5 }
  0x83   :  { %1282 = vperm.xlu1 %2864, %v1124_v7   ;;  %v1132_v7 = vld [vmem:[%s4152_s5 + $0xf8] sm:$0xff] }
  0x84   :  { %1277 = vperm.xlu0 %2863, %v1123_v8   ;;  %v1131_v8 = vld [vmem:[%s4152_s5 + $0xf0] sm:$0xff] }
  0x86   :  { %v3487_v13 = vpop.permute.xlu1 %184 }
  0x87   :  { %v3489_v14 = vpop.permute.xlu0 %174  ;;  %1202 = vperm.xlu1 %2864, %v1108_v11  }
  0x88   :  { %1197 = vperm.xlu0 %2863, %v1107_v12  }
  0x8a   :  { %v3497_v17 = vpop.permute.xlu1 %194 }
  0x8b   :  { %v3499_v18 = vpop.permute.xlu0 %189  ;;  %1442 = vperm.xlu1 %2864, %v1156_v15   ;;  %v1116_v15 = vld [vmem:[%s4152_s5 + $0x78] sm:$0xff] }
  0x8c   :  { %1437 = vperm.xlu0 %2863, %v1155_v16   ;;  %v1115_v16 = vld [vmem:[%s4152_s5 + $0x70] sm:$0xff] }
  0x8e   :  { %v3507_v21 = vpop.permute.xlu1 %204 }
  0x8f   :  { %v3509_v22 = vpop.permute.xlu0 %199  ;;  %1362 = vperm.xlu1 %2864, %v1140_v19  }
  0x90   :  { %1357 = vperm.xlu0 %2863, %v1139_v20  }
  0x92   :  { %v3517_v25 = vpop.permute.xlu1 %214 }
  0x93   :  { %v3519_v26 = vpop.permute.xlu0 %209  ;;  %1292 = vperm.xlu1 %2864, %v1126_v23   ;;  %v1164_v23 = vld [vmem:[%s4152_s5 + $0x1f8] sm:$0xff] }
  0x94   :  { %1287 = vperm.xlu0 %2863, %v1125_v24   ;;  %v1163_v24 = vld [vmem:[%s4152_s5 + $0x1f0] sm:$0xff] }
  0x96   :  { %v3527_v29 = vpop.permute.xlu1 %224 }
  0x97   :  { %v3529_v30 = vpop.permute.xlu0 %219  ;;  %1212 = vperm.xlu1 %2864, %v1110_v27  }
  0x98   :  { %1207 = vperm.xlu0 %2863, %v1109_v28  }
  0x9a   :  { %v3537_v33 = vpop.permute.xlu1 %234 }
  0x9b   :  { %v3539_v34 = vpop.permute.xlu0 %229  ;;  %1452 = vperm.xlu1 %2864, %v1158_v31   ;;  %v1148_v31 = vld [vmem:[%s4152_s5 + $0x178] sm:$0xff] }
  0x9c   :  { %1447 = vperm.xlu0 %2863, %v1157_v32   ;;  %v1147_v32 = vld [vmem:[%s4152_s5 + $0x170] sm:$0xff] }
  0x9e   :  { %v3547_v37 = vpop.permute.xlu1 %244 }
  0x9f   :  { %v3549_v38 = vpop.permute.xlu0 %239  ;;  %1372 = vperm.xlu1 %2864, %v1142_v35  }
  0xa0   :  { %1367 = vperm.xlu0 %2863, %v1141_v36  }
  0xa2   :  { %v3557_v41 = vpop.permute.xlu1 %254 }
  0xa3   :  { %v3559_v42 = vpop.permute.xlu0 %249  ;;  %1302 = vperm.xlu1 %2864, %v1128_v39   ;;  %v152_v39 = vld [vmem:[%s4150_s3 + $0x188] sm:$0xff] }
  0xa4   :  { %1297 = vperm.xlu0 %2863, %v1127_v40   ;;  %v151_v40 = vld [vmem:[%s4150_s3 + $0x180] sm:$0xff] }
  0xa6   :  { %v3567_v45 = vpop.permute.xlu1 %264 }
  0xa7   :  { %v3569_v46 = vpop.permute.xlu0 %259  ;;  %1222 = vperm.xlu1 %2864, %v1112_v43   ;;  %v3680_v43 = vld [vmem:[%s4154_s7] sm:$0xff] }
  0xa8   :  { %1217 = vperm.xlu0 %2863, %v1111_v44   ;;  %4159 = vst [vmem:[#allocation6_spill] sm:$0xff] %v3680_v43  ;;  %v2567_v44 = vcombine.high %v3680_v43, %v3680_v43 }
  0xaa   :  { %v3577_v49 = vpop.permute.xlu1 %274  ;;  %2273 = vmatprep.mubr.bf16.mxu0 %v2567_v44 }
  0xab   :  { %v3579_v50 = vpop.permute.xlu0 %269  ;;  %1462 = vperm.xlu1 %2864, %v1160_v47  }
  0xac   :  { %1457 = vperm.xlu0 %2863, %v1159_v48  }
  0xae   :  { %v3587_v53 = vpop.permute.xlu1 %284 }
  0xaf   :  { %v3589_v54 = vpop.permute.xlu0 %279  ;;  %1382 = vperm.xlu1 %2864, %v1144_v51   ;;  %v154_v51 = vld [vmem:[%s4150_s3 + $0x198] sm:$0xff] }
  0xb0   :  { %1377 = vperm.xlu0 %2863, %v1143_v52   ;;  %v153_v52 = vld [vmem:[%s4150_s3 + $0x190] sm:$0xff] }
  0xb2   :  { %v3597_v57 = vpop.permute.xlu1 %294 }
  0xb3   :  { %v3599_v58 = vpop.permute.xlu0 %289  ;;  %1312 = vperm.xlu1 %2864, %v1130_v55  }
  0xb4   :  { %1307 = vperm.xlu0 %2863, %v1129_v56  }
  0xb6   :  { %v3607_v61 = vpop.permute.xlu1 %304 }
  0xb7   :  { %v3609_v62 = vpop.permute.xlu0 %299  ;;  %1232 = vperm.xlu1 %2864, %v1114_v59   ;;  %v156_v59 = vld [vmem:[%s4150_s3 + $0x1a8] sm:$0xff] }
  0xb8   :  { %1227 = vperm.xlu0 %2863, %v1113_v60   ;;  %v155_v60 = vld [vmem:[%s4150_s3 + $0x1a0] sm:$0xff] }
  0xba   :  { %v3617_v1 = vpop.permute.xlu1 %314 }
  0xbb   :  { %v3619_v2 = vpop.permute.xlu0 %309  ;;  %1472 = vperm.xlu1 %2864, %v1162_v63  }
  0xbc   :  { %1467 = vperm.xlu0 %2863, %v1161_v0  }
  0xbe   :  { %v3627_v5 = vpop.permute.xlu1 %324 }
  0xbf   :  { %v3629_v6 = vpop.permute.xlu0 %319  ;;  %1392 = vperm.xlu1 %2864, %v1146_v3  }
  0xc0   :  { %1387 = vperm.xlu0 %2863, %v1145_v4  }
  0xc2   :  { %v3637_v11 = vpop.permute.xlu1 %334 }
  0xc3   :  { %v3639_v12 = vpop.permute.xlu0 %329  ;;  %1322 = vperm.xlu1 %2864, %v1132_v7   ;;  %v158_v7 = vld [vmem:[%s4150_s3 + $0x1b8] sm:$0xff] }
  0xc4   :  { %1317 = vperm.xlu0 %2863, %v1131_v8   ;;  %v157_v8 = vld [vmem:[%s4150_s3 + $0x1b0] sm:$0xff] }
  0xc6   :  { %v3647_v19 = vpop.permute.xlu1 %344 }
  0xc7   :  { %v3649_v20 = vpop.permute.xlu0 %339  ;;  %1242 = vperm.xlu1 %2864, %v1116_v15  }
  0xc8   :  { %1237 = vperm.xlu0 %2863, %v1115_v16  }
  0xca   :  { %v3657_v27 = vpop.permute.xlu1 %354 }
  0xcb   :  { %4158 = vst [vmem:[#allocation5_spill] sm:$0xff] %v3657_v27  ;;  %v3659_v28 = vpop.permute.xlu0 %349  ;;  %1482 = vperm.xlu1 %2864, %v1164_v23  }
  0xcc   :  { %1477 = vperm.xlu0 %2863, %v1163_v24  }
  0xce   :  { %v3667_v35 = vpop.permute.xlu1 %364 }
  0xcf   :  { %v3669_v36 = vpop.permute.xlu0 %359  ;;  %1402 = vperm.xlu1 %2864, %v1148_v31  }
  0xd0   :  { %1397 = vperm.xlu0 %2863, %v1147_v32  }
  0xd2   :  { %v3684_v47 = vpop.permute.xlu1 %1252 }
  0xd3   :  { %v3686_v48 = vpop.permute.xlu0 %1247  ;;  %414 = vperm.xlu1 %2864, %v152_v39  }
  0xd4   :  { %409 = vperm.xlu0 %2863, %v151_v40  }
  0xd6   :  { %v1173_v55 = vpop.permute.xlu1 %1172 }
  0xd7   :  { %v1168_v56 = vpop.permute.xlu0 %1167  ;;  %424 = vperm.xlu1 %2864, %v154_v51  }
  0xd8   :  { %419 = vperm.xlu0 %2863, %v153_v52  }
  0xda   :  { %v3700_v63 = vpop.permute.xlu1 %1412 }
  0xdb   :  { %4160 = vst [vmem:[#allocation7_spill] sm:$0xff] %v3700_v63  ;;  %v3702_v0 = vpop.permute.xlu0 %1407  ;;  %434 = vperm.xlu1 %2864, %v156_v59  }
  0xdc   :  { %4161 = vst [vmem:[#allocation8_spill] sm:$0xff] %v3702_v0  ;;  %429 = vperm.xlu0 %2863, %v155_v60   ;;  %v2732_v4 = vpop.f32.mrb[0].mxu0  ;;  %v160_v60 = vld [vmem:[%s4150_s3 + $0x1c8] sm:$0xff] }
  0xdd   :  { %v2798_v3 = vpop.f32.mrb[0].mxu1  ;;  %v782_v16 = vpop.f32.mrb[1].mxu0  ;;  %v791_v23 = vadd.f32 %v2732_v4, %v3477_v9  ;;  %v159_v9 = vld [vmem:[%s4150_s3 + $0x1c0] sm:$0xff] }
  0xde   :  { %v1776_v15 = vpop.f32.mrb[1].mxu1  ;;  %v3711_v31 = vpop.permute.xlu1 %1332  ;;  %v783_v39 = vadd.f32 %v782_v16, %v3479_v10 }
  0xdf   :  { %v2799_v24 = vpop.f32.mrb[2].mxu1  ;;  %v1777_v32 = vadd.f32 %v1776_v15, %v1168_v56  ;;  %v3714_v40 = vpop.permute.xlu0 %1327  ;;  %444 = vperm.xlu1 %2864, %v158_v7   ;;  %v2033_v4 = vmax.f32 %v791_v23, 0.0 }
  0xe0   :  { %v2733_v44 = vpop.f32.mrb[2].mxu0  ;;  %439 = vperm.xlu0 %2863, %v157_v8   ;;  %v1779_v52 = vpop.f32.mrb[3].mxu1  ;;  %v2031_v8 = vmax.f32 %v783_v39, 0.0 }
  0xe1   :  { %v794_v51 = vadd.f32 %v2733_v44, %v3487_v13  ;;  %v785_v59 = vpop.f32.mrb[3].mxu0  ;;  %v1780_v56 = vadd.f32 %v1779_v52, %v1173_v55  ;;  %v2095_v7 = vmax.f32 %v1777_v32, 0.0  ;;  %v143_v55 = vld [vmem:[%s4150_s3 + $0x140] sm:$0xff] }
  0xe2   :  { %v786_v10 = vadd.f32 %v785_v59, %v3489_v14  ;;  %v3724_v16 = vpop.permute.xlu1 %1262  ;;  %v144_v14 = vld [vmem:[%s4150_s3 + $0x148] sm:$0xff] }
  0xe3   :  { %v2034_v15 = vmax.f32 %v794_v51, 0.0  ;;  %v2096_v13 = vmax.f32 %v1780_v56, 0.0  ;;  %v3726_v43 = vpop.permute.xlu0 %1257  ;;  %454 = vperm.xlu1 %2864, %v160_v60   ;;  %v2226_v59 = vld [vmem:[%s4154_s7 + $0x8] sm:$0xff] }
  0xe4   :  { %v2032_v44 = vmax.f32 %v786_v10, 0.0  ;;  %449 = vperm.xlu0 %2863, %v159_v9   ;;  %v2736_v0 = vpop.f32.mrb[4].mxu0  ;;  %v2569_v56 = vcombine.high %v2226_v59, %v2226_v59  ;;  %v161_v59 = vld [vmem:[%s4150_s3 + $0x1d0] sm:$0xff] }
  0xe5   :  { %v3728_v63 = vpack.c.bf16 %v2034_v15, %v2033_v4  ;;  %v3730_v27 = vpop.f32.mrb[4].mxu1  ;;  %v3738_v23 = vpack.c.bf16 %v2096_v13, %v2095_v7  ;;  %v807_v39 = vadd.f32 %v2736_v0, %v3509_v22  ;;  %v798_v51 = vpop.f32.mrb[5].mxu0 }
  0xe6   :  { %v3740_v32 = vpack.c.bf16 %v2032_v44, %v2031_v8  ;;  %v3743_v52 = vpop.f32.mrb[5].mxu1  ;;  %v2737_v60 = vpop.f32.mrb[6].mxu0  ;;  %v799_v10 = vadd.f32 %v798_v51, %v3499_v18  ;;  %v162_v44 = vld [vmem:[%s4150_s3 + $0x1d8] sm:$0xff]  ;;  %2313 = vmatprep.mubr.bf16.mxu1 %v2569_v56 }
  0xe7   :  { %4162 = vst [vmem:[#allocation9_spill] sm:$0xff] %v3728_v63  ;;  %v3748_v9 = vpop.f32.mrb[6].mxu1  ;;  %v810_v4 = vadd.f32 %v2737_v60, %v3507_v21  ;;  %v1183_v15 = vpop.permute.xlu1 %1182  ;;  %374 = vperm.xlu1 %2864, %v144_v14   ;;  %v2037_v18 = vmax.f32 %v807_v39, 0.0  ;;  %v145_v39 = vld [vmem:[%s4150_s3 + $0x150] sm:$0xff] }
  0xe8   :  { %4163 = vst [vmem:[#allocation10_spill] sm:$0xff] %v3740_v32  ;;  %v1178_v7 = vpop.permute.xlu0 %1177  ;;  %369 = vperm.xlu0 %2863, %v143_v55   ;;  %v1788_v22 = vadd.f32 %v2799_v24, %v1183_v15  ;;  %v801_v8 = vpop.f32.mrb[7].mxu0  ;;  %v2035_v24 = vmax.f32 %v799_v10, 0.0 }
  0xe9   :  { %v1785_v0 = vadd.f32 %v2798_v3, %v1178_v7  ;;  %v3752_v13 = vpop.f32.mrb[7].mxu1  ;;  %v2038_v21 = vmax.f32 %v810_v4, 0.0  ;;  %v802_v51 = vadd.f32 %v801_v8, %v3497_v17  ;;  %v146_v17 = vld [vmem:[%s4150_s3 + $0x158] sm:$0xff] }
  0xea   :  { %v2098_v14 = vmax.f32 %v1788_v22, 0.0 }
  0xeb   :  { %v2097_v55 = vmax.f32 %v1785_v0, 0.0  ;;  %v3761_v3 = vpack.c.bf16 %v2038_v21, %v2037_v18  ;;  %v2036_v60 = vmax.f32 %v802_v51, 0.0  ;;  %v3763_v15 = vpop.permute.xlu1 %1422  ;;  %464 = vperm.xlu1 %2864, %v162_v44  }
  0xec   :  { %4165 = vst [vmem:[#allocation12_spill] sm:$0xff] %v3763_v15  ;;  %v3765_v7 = vpop.permute.xlu0 %1417  ;;  %459 = vperm.xlu0 %2863, %v161_v59   ;;  %v2740_v32 = vpop.f32.mrb[8].mxu0 }
  0xed   :  { %4164 = vst [vmem:[#allocation11_spill] sm:$0xff] %v3761_v3  ;;  %4166 = vst [vmem:[#allocation13_spill] sm:$0xff] %v3765_v7  ;;  %v3767_v63 = vpack.c.bf16 %v2098_v14, %v2097_v55  ;;  %v3769_v56 = vpop.f32.mrb[8].mxu1  ;;  %v3777_v10 = vpack.c.bf16 %v2036_v60, %v2035_v24  ;;  %v823_v4 = vadd.f32 %v2740_v32, %v3529_v30  ;;  %v814_v22 = vpop.f32.mrb[9].mxu0  ;;  %v164_v30 = vld [vmem:[%s4150_s3 + $0x1e8] sm:$0xff]  ;;  %v163_v32 = vld [vmem:[%s4150_s3 + $0x1e0] sm:$0xff] }
  0xee   :  { %v3780_v0 = vpop.f32.mrb[9].mxu1  ;;  %v2741_v8 = vpop.f32.mrb[10].mxu0  ;;  %v815_v59 = vadd.f32 %v814_v22, %v3519_v26 }
  0xef   :  { %4167 = vst [vmem:[#allocation14_spill] sm:$0xff] %v3777_v10  ;;  %v3782_v44 = vpop.f32.mrb[10].mxu1  ;;  %v826_v18 = vadd.f32 %v2741_v8, %v3527_v29  ;;  %v3786_v21 = vpop.permute.xlu1 %1342  ;;  %384 = vperm.xlu1 %2864, %v146_v17   ;;  %v2041_v26 = vmax.f32 %v823_v4, 0.0  ;;  %v148_v4 = vld [vmem:[%s4150_s3 + $0x168] sm:$0xff] }
  0xf0   :  { %v3788_v51 = vpop.permute.xlu0 %1337  ;;  %379 = vperm.xlu0 %2863, %v145_v39   ;;  %v817_v14 = vpop.f32.mrb[11].mxu0  ;;  %v2039_v60 = vmax.f32 %v815_v59, 0.0 }
  0xf1   :  { %v3790_v55 = vpop.f32.mrb[11].mxu1  ;;  %v2042_v24 = vmax.f32 %v826_v18, 0.0  ;;  %v818_v29 = vadd.f32 %v817_v14, %v3517_v25  ;;  %v147_v25 = vld [vmem:[%s4150_s3 + $0x160] sm:$0xff] }
  0xf3   :  { %v3799_v22 = vpack.c.bf16 %v2042_v24, %v2041_v26  ;;  %v2040_v17 = vmax.f32 %v818_v29, 0.0  ;;  %v3801_v39 = vpop.permute.xlu1 %1272  ;;  %474 = vperm.xlu1 %2864, %v164_v30  }
  0xf4   :  { %v3803_v8 = vpop.permute.xlu0 %1267  ;;  %469 = vperm.xlu0 %2863, %v163_v32   ;;  %v2744_v3 = vpop.f32.mrb[12].mxu0 }
  0xf5   :  { %4168 = vst [vmem:[#allocation15_spill] sm:$0xff] %v3799_v22  ;;  %v3805_v10 = vpop.f32.mrb[12].mxu1  ;;  %v3813_v59 = vpack.c.bf16 %v2040_v17, %v2039_v60  ;;  %v839_v18 = vadd.f32 %v2744_v3, %v3549_v38  ;;  %v830_v14 = vpop.f32.mrb[13].mxu0  ;;  %v166_v3 = vld [vmem:[%s4150_s3 + $0x1f8] sm:$0xff] }
  0xf6   :  { %4169 = vst [vmem:[#allocation16_spill] sm:$0xff] %v3805_v10  ;;  %v3816_v26 = vpop.f32.mrb[13].mxu1  ;;  %v2745_v30 = vpop.f32.mrb[14].mxu0  ;;  %v831_v24 = vadd.f32 %v830_v14, %v3539_v34  ;;  %v165_v34 = vld [vmem:[%s4150_s3 + $0x1f0] sm:$0xff] }
  0xf7   :  { %4170 = vst [vmem:[#allocation17_spill] sm:$0xff] %v3813_v59  ;;  %4171 = vst [vmem:[#allocation18_spill] sm:$0xff] %v3816_v26  ;;  %v3818_v32 = vpop.f32.mrb[14].mxu1  ;;  %v842_v29 = vadd.f32 %v2745_v30, %v3547_v37  ;;  %v1193_v22 = vpop.permute.xlu1 %1192  ;;  %394 = vperm.xlu1 %2864, %v148_v4   ;;  %v2045_v37 = vmax.f32 %v839_v18, 0.0 }
  0xf8   :  { %4172 = vst [vmem:[#allocation19_spill] sm:$0xff] %v3818_v32  ;;  %v1188_v10 = vpop.permute.xlu0 %1187  ;;  %389 = vperm.xlu0 %2863, %v147_v25   ;;  %v1796_v15 = vadd.f32 %v3752_v13, %v1193_v22  ;;  %v833_v17 = vpop.f32.mrb[15].mxu0  ;;  %v2043_v13 = vmax.f32 %v831_v24, 0.0 }
  0xf9   :  { %v1793_v60 = vadd.f32 %v3743_v52, %v1188_v10  ;;  %v3824_v38 = vpop.f32.mrb[15].mxu1  ;;  %v2046_v14 = vmax.f32 %v842_v29, 0.0  ;;  %v834_v4 = vadd.f32 %v833_v17, %v3537_v33  ;;  %v150_v33 = vld [vmem:[%s4150_s3 + $0x178] sm:$0xff] }
  0xfa   :  { %v2100_v25 = vmax.f32 %v1796_v15, 0.0  ;;  %v149_v15 = vld [vmem:[%s4150_s3 + $0x170] sm:$0xff] }
  0xfb   :  { %v2099_v30 = vmax.f32 %v1793_v60, 0.0  ;;  %v3833_v22 = vpack.c.bf16 %v2046_v14, %v2045_v37  ;;  %v2044_v52 = vmax.f32 %v834_v4, 0.0  ;;  %v3835_v10 = vpop.permute.xlu1 %1432  ;;  %484 = vperm.xlu1 %2864, %v166_v3  }
  0xfc   :  { %4174 = vst [vmem:[#allocation21_spill] sm:$0xff] %v3835_v10  ;;  %v3837_v59 = vpop.permute.xlu0 %1427  ;;  %479 = vperm.xlu0 %2863, %v165_v34   ;;  %v2748_v7 = vpop.f32.mrb[16].mxu0 }
  0xfd   :  { %4173 = vst [vmem:[#allocation20_spill] sm:$0xff] %v3833_v22  ;;  %v3839_v32 = vpack.c.bf16 %v2100_v25, %v2099_v30  ;;  %v2814_v26 = vpop.f32.mrb[16].mxu1  ;;  %v3847_v18 = vpack.c.bf16 %v2044_v52, %v2043_v13  ;;  %v855_v24 = vadd.f32 %v2748_v7, %v3569_v46  ;;  %v846_v60 = vpop.f32.mrb[17].mxu0 }
  0xfe   :  { %v1849_v29 = vadd.f32 %v2814_v26, %v3726_v43  ;;  %v1840_v17 = vpop.f32.mrb[17].mxu1  ;;  %v847_v3 = vadd.f32 %v846_v60, %v3559_v42  ;;  %v2749_v37 = vpop.f32.mrb[18].mxu0  ;;  %v2415_v42 = vld [vmem:[%s4155_s8] sm:$0xff] }
  0xff   :  { %4175 = vst [vmem:[#allocation22_spill] sm:$0xff] %v3847_v18  ;;  %v1841_v34 = vadd.f32 %v1840_v17, %v3686_v48  ;;  %v2815_v14 = vpop.f32.mrb[18].mxu1  ;;  %v858_v4 = vadd.f32 %v2749_v37, %v3567_v45  ;;  %v3855_v30 = vpop.permute.xlu1 %1352  ;;  %404 = vperm.xlu1 %2864, %v150_v33   ;;  %v2049_v46 = vmax.f32 %v855_v24, 0.0 }
 0x100   :  { %v1852_v25 = vadd.f32 %v2815_v14, %v3724_v16  ;;  %v3857_v13 = vpop.permute.xlu0 %1347  ;;  %399 = vperm.xlu0 %2863, %v149_v15   ;;  %v2113_v43 = vmax.f32 %v1849_v29, 0.0  ;;  %v849_v7 = vpop.f32.mrb[19].mxu0  ;;  %v2047_v60 = vmax.f32 %v847_v3, 0.0 }
 0x101   :  { %v1843_v26 = vpop.f32.mrb[19].mxu1  ;;  %v2050_v48 = vmax.f32 %v858_v4, 0.0  ;;  %v850_v45 = vadd.f32 %v849_v7, %v3557_v41  ;;  %v2111_v17 = vmax.f32 %v1841_v34, 0.0 }
 0x102   :  { %v2114_v52 = vmax.f32 %v1852_v25, 0.0  ;;  %v1844_v16 = vadd.f32 %v1843_v26, %v3684_v47 }
 0x103   :  { %v3864_v37 = vpack.c.bf16 %v2050_v48, %v2049_v46  ;;  %v2048_v15 = vmax.f32 %v850_v45, 0.0  ;;  %v1283_v29 = vpop.permute.xlu1 %1282 }
 0x104   :  { %v2200_v33 = vpack.c.bf16 %v2114_v52, %v2113_v43  ;;  %v2112_v24 = vmax.f32 %v1844_v16, 0.0  ;;  %v1278_v14 = vpop.permute.xlu0 %1277  ;;  %2418 = vperm.xlu0 %2863, %v2415_v42   ;;  %v2752_v22 = vpop.f32.mrb[20].mxu0 }
 0x105   :  { %v2818_v18 = vpop.f32.mrb[20].mxu1  ;;  %v3866_v10 = vpack.c.bf16 %v2048_v15, %v2047_v60  ;;  %v871_v25 = vadd.f32 %v2752_v22, %v3589_v54  ;;  %v862_v7 = vpop.f32.mrb[21].mxu0 }
 0x106   :  { %v2199_v4 = vpack.c.bf16 %v2112_v24, %v2111_v17  ;;  %v1865_v41 = vadd.f32 %v2818_v18, %v1278_v14  ;;  %v1856_v47 = vpop.f32.mrb[21].mxu1  ;;  %v863_v3 = vadd.f32 %v862_v7, %v3579_v50  ;;  %v2753_v46 = vpop.f32.mrb[22].mxu0 }
 0x107   :  { %v1857_v34 = vadd.f32 %v1856_v47, %v3803_v8  ;;  %v2819_v43 = vpop.f32.mrb[22].mxu1  ;;  %v874_v26 = vadd.f32 %v2753_v46, %v3587_v53  ;;  %v1203_v42 = vpop.permute.xlu1 %1202  ;;  %v2053_v45 = vmax.f32 %v871_v25, 0.0 }
 0x108   :  { %v1868_v48 = vadd.f32 %v2819_v43, %v1283_v29  ;;  %2640 = vmatprep.subr.bf16.mxu0 %v2199_v4  ;;  %v1198_v52 = vpop.permute.xlu0 %1197  ;;  %v2117_v16 = vmax.f32 %v1865_v41, 0.0  ;;  %v1804_v60 = vadd.f32 %v3748_v9, %v1203_v42  ;;  %v865_v22 = vpop.f32.mrb[23].mxu0  ;;  %v2051_v15 = vmax.f32 %v863_v3, 0.0 }
 0x109   :  { %v1801_v54 = vadd.f32 %v3730_v27, %v1198_v52  ;;  %v1859_v18 = vpop.f32.mrb[23].mxu1  ;;  %2641 = vmatpush3.bf16.msra.mxu0 %v3738_v23  ;;  %v2054_v50 = vmax.f32 %v874_v26, 0.0  ;;  %v866_v17 = vadd.f32 %v865_v22, %v3577_v49  ;;  %v2115_v24 = vmax.f32 %v1857_v34, 0.0 }
 0x10a   :  { %v2118_v8 = vmax.f32 %v1868_v48, 0.0  ;;  %v1860_v53 = vadd.f32 %v1859_v18, %v3801_v39  ;;  %2642 = vmatprep.subr.bf16.mxu0 %v2200_v33  ;;  %v2102_v29 = vmax.f32 %v1804_v60, 0.0 }
 0x10b   :  { %v2101_v14 = vmax.f32 %v1801_v54, 0.0  ;;  %v3877_v4 = vpack.c.bf16 %v2054_v50, %v2053_v45  ;;  %v2052_v25 = vmax.f32 %v866_v17, 0.0  ;;  %v3879_v41 = vpop.permute.xlu1 %1442 }
 0x10c   :  { %v2202_v9 = vpack.c.bf16 %v2118_v8, %v2117_v16  ;;  %v2116_v27 = vmax.f32 %v1860_v53, 0.0  ;;  %v3881_v7 = vpop.permute.xlu0 %1437  ;;  %v2756_v49 = vpop.f32.mrb[24].mxu0 }
 0x10d   :  { %v2194_v23 = vpack.c.bf16 %v2102_v29, %v2101_v14  ;;  %2643 = vmatpush3.bf16.msra.mxu0 %v3767_v63  ;;  %v3884_v47 = vpop.f32.mrb[24].mxu1  ;;  %v3886_v39 = vpack.c.bf16 %v2052_v25, %v2051_v15  ;;  %v887_v3 = vadd.f32 %v2756_v49, %v3609_v62  ;;  %v878_v34 = vpop.f32.mrb[25].mxu0 }
 0x10e   :  { %v2201_v33 = vpack.c.bf16 %v2116_v27, %v2115_v24  ;;  %v1872_v46 = vpop.f32.mrb[25].mxu1  ;;  %v2757_v43 = vpop.f32.mrb[26].mxu0  ;;  %v879_v48 = vadd.f32 %v878_v34, %v3599_v58 }
 0x10f   :  { %v3889_v26 = vpop.f32.mrb[26].mxu1  ;;  %v890_v42 = vadd.f32 %v2757_v43, %v3607_v61  ;;  %v3893_v52 = vpop.permute.xlu1 %1362  ;;  %v2057_v60 = vmax.f32 %v887_v3, 0.0 }
 0x110   :  { %2644 = vmatprep.subr.bf16.mxu0 %v2201_v33  ;;  %v3895_v63 = vpop.permute.xlu0 %1357  ;;  %v881_v45 = vpop.f32.mrb[27].mxu0  ;;  %v2055_v22 = vmax.f32 %v879_v48, 0.0 }
 0x111   :  { %v1875_v16 = vpop.f32.mrb[27].mxu1  ;;  %2645 = vmatpush3.bf16.msra.mxu0 %v3839_v32  ;;  %v2058_v62 = vmax.f32 %v890_v42, 0.0  ;;  %v882_v54 = vadd.f32 %v881_v45, %v3597_v57 }
 0x112   :  { %2646 = vmatprep.subr.bf16.mxu0 %v2202_v9 }
 0x113   :  { %v3899_v18 = vpack.c.bf16 %v2058_v62, %v2057_v60  ;;  %v2056_v58 = vmax.f32 %v882_v54, 0.0  ;;  %v1293_v50 = vpop.permute.xlu1 %1292 }
 0x114   :  { %v1288_v61 = vpop.permute.xlu0 %1287  ;;  %v1876_v8 = vadd.f32 %v1875_v16, %v1293_v50  ;;  %v2760_v53 = vpop.f32.mrb[28].mxu0 }
 0x115   :  { %v1873_v17 = vadd.f32 %v1872_v46, %v1288_v61  ;;  %2647 = vmatpush3.bf16.msra.mxu0 %v2194_v23  ;;  %v3901_v15 = vpop.f32.mrb[28].mxu1  ;;  %v3903_v24 = vpack.c.bf16 %v2056_v58, %v2055_v22  ;;  %v903_v32 = vadd.f32 %v2760_v53, %v3629_v6  ;;  %v894_v29 = vpop.f32.mrb[29].mxu0 }
 0x116   :  { %v3906_v14 = vpop.f32.mrb[29].mxu1  ;;  %v2120_v57 = vmax.f32 %v1876_v8, 0.0  ;;  %v2761_v25 = vpop.f32.mrb[30].mxu0  ;;  %v895_v49 = vadd.f32 %v894_v29, %v3619_v2 }
 0x117   :  { %v2119_v9 = vmax.f32 %v1873_v17, 0.0  ;;  %v3908_v27 = vpop.f32.mrb[30].mxu1  ;;  %v906_v33 = vadd.f32 %v2761_v25, %v3627_v5  ;;  %v1213_v23 = vpop.permute.xlu1 %1212  ;;  %v2061_v42 = vmax.f32 %v903_v32, 0.0 }
 0x118   :  { %v1208_v3 = vpop.permute.xlu0 %1207  ;;  %v1812_v46 = vadd.f32 %v3790_v55, %v1213_v23  ;;  %v897_v6 = vpop.f32.mrb[31].mxu0  ;;  %v2059_v2 = vmax.f32 %v895_v49, 0.0 }
 0x119   :  { %v2203_v34 = vpack.c.bf16 %v2120_v57, %v2119_v9  ;;  %v1809_v43 = vadd.f32 %v3780_v0, %v1208_v3  ;;  %v3914_v48 = vpop.f32.mrb[31].mxu1  ;;  %v2062_v45 = vmax.f32 %v906_v33, 0.0  ;;  %v898_v16 = vadd.f32 %v897_v6, %v3617_v1 }
 0x11a   :  { %v2104_v60 = vmax.f32 %v1812_v46, 0.0 }
 0x11b   :  { %v2103_v62 = vmax.f32 %v1809_v43, 0.0  ;;  %2648 = vmatprep.subr.bf16.mxu0 %v2203_v34  ;;  %v3917_v54 = vpack.c.bf16 %v2062_v45, %v2061_v42  ;;  %v2060_v5 = vmax.f32 %v898_v16, 0.0  ;;  %v3919_v22 = vpop.permute.xlu1 %1452 }
 0x11c   :  { %v3921_v58 = vpop.permute.xlu0 %1447  ;;  %v2764_v0 = vpop.f32.mrb[32].mxu0 }
 0x11d   :  { %v2195_v55 = vpack.c.bf16 %v2104_v60, %v2103_v62  ;;  %v2830_v50 = vpop.f32.mrb[32].mxu1  ;;  %v3923_v61 = vpack.c.bf16 %v2060_v5, %v2059_v2  ;;  %v919_v8 = vadd.f32 %v2764_v0, %v3649_v20  ;;  %v910_v17 = vpop.f32.mrb[33].mxu0 }
 0x11e   :  { %v1913_v1 = vadd.f32 %v2830_v50, %v3788_v51  ;;  %v1904_v53 = vpop.f32.mrb[33].mxu1  ;;  %v911_v32 = vadd.f32 %v910_v17, %v3639_v12  ;;  %v2765_v57 = vpop.f32.mrb[34].mxu0 }
 0x11f   :  { %v1905_v29 = vadd.f32 %v1904_v53, %v3714_v40  ;;  %v2831_v9 = vpop.f32.mrb[34].mxu1  ;;  %2649 = vmatpush3.bf16.msra.mxu0 %v2195_v55  ;;  %v922_v25 = vadd.f32 %v2765_v57, %v3647_v19  ;;  %v3931_v33 = vpop.permute.xlu1 %1372  ;;  %v2065_v20 = vmax.f32 %v919_v8, 0.0 }
 0x120   :  { %v1916_v49 = vadd.f32 %v2831_v9, %v3786_v21  ;;  %v3933_v23 = vpop.permute.xlu0 %1367  ;;  %v2129_v3 = vmax.f32 %v1913_v1, 0.0  ;;  %v913_v51 = vpop.f32.mrb[35].mxu0  ;;  %v2063_v6 = vmax.f32 %v911_v32, 0.0 }
 0x121   :  { %v1907_v34 = vpop.f32.mrb[35].mxu1  ;;  %v2066_v46 = vmax.f32 %v922_v25, 0.0  ;;  %v914_v12 = vadd.f32 %v913_v51, %v3637_v11  ;;  %v2127_v42 = vmax.f32 %v1905_v29, 0.0 }
 0x122   :  { %v2130_v43 = vmax.f32 %v1916_v49, 0.0  ;;  %v1908_v40 = vadd.f32 %v1907_v34, %v3711_v31 }
 0x123   :  { %v3937_v45 = vpack.c.bf16 %v2066_v46, %v2065_v20  ;;  %v2064_v21 = vmax.f32 %v914_v12, 0.0  ;;  %v1303_v60 = vpop.permute.xlu1 %1302 }
 0x124   :  { %v3939_v19 = vpack.c.bf16 %v2130_v43, %v2129_v3  ;;  %v2128_v16 = vmax.f32 %v1908_v40, 0.0  ;;  %v1298_v62 = vpop.permute.xlu0 %1297  ;;  %v1884_v2 = vadd.f32 %v3889_v26, %v1303_v60  ;;  %v2768_v55 = vpop.f32.mrb[36].mxu0 }
 0x125   :  { %v1881_v5 = vadd.f32 %v3884_v47, %v1298_v62  ;;  %v2834_v0 = vpop.f32.mrb[36].mxu1  ;;  %v3943_v50 = vpack.c.bf16 %v2064_v21, %v2063_v6  ;;  %v935_v31 = vadd.f32 %v2768_v55, %v3669_v36  ;;  %v926_v1 = vpop.f32.mrb[37].mxu0 }
 0x126   :  { %v3945_v11 = vpack.c.bf16 %v2128_v16, %v2127_v42  ;;  %v1929_v8 = vadd.f32 %v2834_v0, %v3895_v63  ;;  %v1920_v17 = vpop.f32.mrb[37].mxu1  ;;  %v2122_v53 = vmax.f32 %v1884_v2, 0.0  ;;  %v927_v29 = vadd.f32 %v926_v1, %v3659_v28  ;;  %v2769_v57 = vpop.f32.mrb[38].mxu0 }
 0x127   :  { %v2121_v32 = vmax.f32 %v1881_v5, 0.0  ;;  %v1921_v26 = vadd.f32 %v1920_v17, %v3857_v13  ;;  %v2835_v47 = vpop.f32.mrb[38].mxu1  ;;  %v938_v9 = vadd.f32 %v2769_v57, %v3667_v35  ;;  %v1223_v49 = vpop.permute.xlu1 %1222  ;;  %v2069_v36 = vmax.f32 %v935_v31, 0.0  ;;  %v4176_v13 = vld [vmem:[#allocation5_spill] sm:$0xff] }
 0x128   :  { %v1932_v25 = vadd.f32 %v2835_v47, %v3893_v52  ;;  %v1218_v20 = vpop.permute.xlu0 %1217  ;;  %v2133_v51 = vmax.f32 %v1929_v8, 0.0  ;;  %v1820_v63 = vadd.f32 %v3782_v44, %v1223_v49  ;;  %v929_v34 = vpop.f32.mrb[39].mxu0  ;;  %v2067_v6 = vmax.f32 %v927_v29, 0.0 }
 0x129   :  { %v2204_v3 = vpack.c.bf16 %v2122_v53, %v2121_v32  ;;  %v1923_v46 = vpop.f32.mrb[39].mxu1  ;;  %v2070_v43 = vmax.f32 %v938_v9, 0.0  ;;  %v1817_v28 = vadd.f32 %v3769_v56, %v1218_v20  ;;  %v930_v40 = vadd.f32 %v929_v34, %v4176_v13 }
 0x12a   :  { %v2134_v12 = vmax.f32 %v1932_v25, 0.0  ;;  %v2106_v42 = vmax.f32 %v1820_v63, 0.0  ;;  %v1924_v35 = vadd.f32 %v1923_v46, %v3855_v30  ;;  %v2131_v2 = vmax.f32 %v1921_v26, 0.0 }
 0x12b   :  { %2650 = vmatprep.subr.bf16.mxu0 %v2204_v3  ;;  %v3957_v52 = vpack.c.bf16 %v2070_v43, %v2069_v36  ;;  %v2105_v16 = vmax.f32 %v1817_v28, 0.0  ;;  %v2068_v60 = vmax.f32 %v930_v40, 0.0  ;;  %v3961_v44 = vpop.permute.xlu1 %1462 }
 0x12c   :  { %v3959_v21 = vpack.c.bf16 %v2134_v12, %v2133_v51  ;;  %v3963_v62 = vpop.permute.xlu0 %1457  ;;  %v2132_v5 = vmax.f32 %v1924_v35, 0.0  ;;  %v3965_v55 = vpop.f32.mrb[40].mxu0 }
 0x12d   :  { %v2838_v56 = vpop.f32.mrb[40].mxu1  ;;  %v2196_v0 = vpack.c.bf16 %v2106_v42, %v2105_v16  ;;  %v3967_v31 = vpack.c.bf16 %v2068_v60, %v2067_v6  ;;  %v3969_v8 = vpop.f32.mrb[41].mxu0 }
 0x12e   :  { %v1936_v30 = vpop.f32.mrb[41].mxu1  ;;  %v3971_v1 = vpack.c.bf16 %v2132_v5, %v2131_v2  ;;  %v3973_v53 = vpop.f32.mrb[42].mxu0  ;;  %v4180_v5 = vld [vmem:[#allocation18_spill] sm:$0xff] }
 0x12f   :  { %v2839_v17 = vpop.f32.mrb[42].mxu1  ;;  %v1937_v32 = vadd.f32 %v1936_v30, %v3933_v23  ;;  %2651 = vmatpush3.bf16.msra.mxu0 %v2196_v0  ;;  %v1383_v29 = vpop.permute.xlu1 %1382 }
 0x130   :  { %v1378_v26 = vpop.permute.xlu0 %1377  ;;  %v1948_v57 = vadd.f32 %v2839_v17, %v1383_v29  ;;  %v1939_v9 = vpop.f32.mrb[43].mxu1 }
 0x131   :  { %v1945_v47 = vadd.f32 %v2838_v56, %v1378_v26  ;;  %v3976_v25 = vpop.f32.mrb[43].mxu0  ;;  %v1940_v49 = vadd.f32 %v1939_v9, %v3931_v33  ;;  %v2135_v36 = vmax.f32 %v1937_v32, 0.0 }
 0x132   :  { %v2138_v20 = vmax.f32 %v1948_v57, 0.0 }
 0x133   :  { %v2137_v3 = vmax.f32 %v1945_v47, 0.0  ;;  %v2136_v51 = vmax.f32 %v1940_v49, 0.0  ;;  %v1313_v63 = vpop.permute.xlu1 %1312  ;;  %v4181_v49 = vld [vmem:[#allocation13_spill] sm:$0xff] }
 0x134   :  { %v1308_v34 = vpop.permute.xlu0 %1307  ;;  %v1892_v23 = vadd.f32 %v3914_v48, %v1313_v63  ;;  %v3985_v28 = vpop.f32.mrb[44].mxu0  ;;  %v4182_v63 = vld [vmem:[#allocation8_spill] sm:$0xff] }
 0x135   :  { %v3979_v46 = vpack.c.bf16 %v2138_v20, %v2137_v3  ;;  %v1889_v43 = vadd.f32 %v3906_v14, %v1308_v34  ;;  %v3983_v12 = vpop.f32.mrb[44].mxu1  ;;  %4177 = vst [vmem:[#allocation5_spill] sm:$0xff] %v3985_v28  ;;  %v3987_v13 = vpack.c.bf16 %v2136_v51, %v2135_v36  ;;  %v3989_v33 = vpop.f32.mrb[45].mxu0 }
 0x136   :  { %v1952_v40 = vpop.f32.mrb[45].mxu1  ;;  %4178 = vst [vmem:[#allocation23_spill] sm:$0xff] %v3989_v33  ;;  %v2124_v6 = vmax.f32 %v1892_v23, 0.0  ;;  %v3993_v16 = vpop.f32.mrb[46].mxu0  ;;  %v4183_v23 = vld [vmem:[#allocation12_spill] sm:$0xff] }
 0x137   :  { %v2123_v42 = vmax.f32 %v1889_v43, 0.0  ;;  %v3991_v35 = vpop.f32.mrb[46].mxu1  ;;  %4179 = vst [vmem:[#allocation24_spill] sm:$0xff] %v3993_v16  ;;  %v1233_v60 = vpop.permute.xlu1 %1232 }
 0x138   :  { %v1228_v2 = vpop.permute.xlu0 %1227  ;;  %v1828_v14 = vadd.f32 %v3824_v38, %v1233_v60  ;;  %v1955_v0 = vpop.f32.mrb[47].mxu1 }
 0x139   :  { %v2205_v48 = vpack.c.bf16 %v2124_v6, %v2123_v42  ;;  %v1825_v56 = vadd.f32 %v4180_v5, %v1228_v2  ;;  %v3997_v30 = vpop.f32.mrb[47].mxu0 }
 0x13a   :  { %v2108_v17 = vmax.f32 %v1828_v14, 0.0 }
 0x13b   :  { %v2107_v32 = vmax.f32 %v1825_v56, 0.0  ;;  %2652 = vmatprep.subr.bf16.mxu0 %v2205_v48  ;;  %v3999_v29 = vpop.permute.xlu1 %1472 }
 0x13c   :  { %v4001_v26 = vpop.permute.xlu0 %1467  ;;  %v4003_v9 = vpop.f32.mrb[48].mxu0 }
 0x13d   :  { %v2197_v57 = vpack.c.bf16 %v2108_v17, %v2107_v32  ;;  %v2846_v47 = vpop.f32.mrb[48].mxu1  ;;  %v4006_v38 = vpop.f32.mrb[49].mxu0  ;;  %v4184_v17 = vld [vmem:[#allocation7_spill] sm:$0xff] }
 0x13e   :  { %v1977_v20 = vadd.f32 %v2846_v47, %v4181_v49  ;;  %v1968_v3 = vpop.f32.mrb[49].mxu1  ;;  %v4008_v51 = vpop.f32.mrb[50].mxu0 }
 0x13f   :  { %v2847_v36 = vpop.f32.mrb[50].mxu1  ;;  %2653 = vmatpush3.bf16.msra.mxu0 %v2197_v57  ;;  %v1969_v34 = vadd.f32 %v1968_v3, %v4182_v63  ;;  %v1393_v6 = vpop.permute.xlu1 %1392 }
 0x140   :  { %v1980_v43 = vadd.f32 %v2847_v36, %v4183_v23  ;;  %v1388_v42 = vpop.permute.xlu0 %1387  ;;  %v1956_v60 = vadd.f32 %v1955_v0, %v1393_v6  ;;  %v1971_v48 = vpop.f32.mrb[51].mxu1  ;;  %v2145_v5 = vmax.f32 %v1977_v20, 0.0 }
 0x141   :  { %v1953_v2 = vadd.f32 %v1952_v40, %v1388_v42  ;;  %v4012_v14 = vpop.f32.mrb[51].mxu0  ;;  %v1972_v32 = vadd.f32 %v1971_v48, %v4184_v17  ;;  %v2143_v57 = vmax.f32 %v1969_v34, 0.0  ;;  %v4185_v17 = vld [vmem:[#allocation19_spill] sm:$0xff] }
 0x142   :  { %v2146_v56 = vmax.f32 %v1980_v43, 0.0  ;;  %v2140_v47 = vmax.f32 %v1956_v60, 0.0 }
 0x143   :  { %v2139_v49 = vmax.f32 %v1953_v2, 0.0  ;;  %v2144_v16 = vmax.f32 %v1972_v32, 0.0  ;;  %v1323_v33 = vpop.permute.xlu1 %1322  ;;  %v4186_v32 = vld [vmem:[#allocation16_spill] sm:$0xff] }
 0x144   :  { %v2216_v28 = vpack.c.bf16 %v2146_v56, %v2145_v5  ;;  %v1318_v3 = vpop.permute.xlu0 %1317  ;;  %v1900_v36 = vadd.f32 %v3908_v27, %v1323_v33  ;;  %v4019_v23 = vpop.f32.mrb[52].mxu0 }
 0x145   :  { %v4015_v63 = vpack.c.bf16 %v2140_v47, %v2139_v49  ;;  %v1897_v40 = vadd.f32 %v3901_v15, %v1318_v3  ;;  %v2850_v0 = vpop.f32.mrb[52].mxu1  ;;  %v2215_v20 = vpack.c.bf16 %v2144_v16, %v2143_v57  ;;  %v4022_v42 = vpop.f32.mrb[53].mxu0 }
 0x146   :  { %v1993_v43 = vadd.f32 %v2850_v0, %v3881_v7  ;;  %v1984_v6 = vpop.f32.mrb[53].mxu1  ;;  %v2126_v34 = vmax.f32 %v1900_v36, 0.0  ;;  %v4024_v48 = vpop.f32.mrb[54].mxu0  ;;  %v4187_v36 = vld [vmem:[#allocation21_spill] sm:$0xff] }
 0x147   :  { %v2125_v60 = vmax.f32 %v1897_v40, 0.0  ;;  %v2851_v2 = vpop.f32.mrb[54].mxu1  ;;  %v1985_v5 = vadd.f32 %v1984_v6, %v3837_v59  ;;  %2662 = vmatprep.subr.bf16.mxu1 %v2215_v20  ;;  %v1243_v15 = vpop.permute.xlu1 %1242 }
 0x148   :  { %v1996_v27 = vadd.f32 %v2851_v2, %v3879_v41  ;;  %v1238_v33 = vpop.permute.xlu0 %1237  ;;  %v1836_v16 = vadd.f32 %v4185_v17, %v1243_v15  ;;  %v1987_v47 = vpop.f32.mrb[55].mxu1  ;;  %2663 = vmatpush3.bf16.msra.mxu1 %v3945_v11  ;;  %v2149_v57 = vmax.f32 %v1993_v43, 0.0  ;;  %v4037_v2 = vld [vmem:[%s4153_s6] sm:$0xff] }
 0x149   :  { %v2206_v56 = vpack.c.bf16 %v2126_v34, %v2125_v60  ;;  %v1833_v7 = vadd.f32 %v4186_v32, %v1238_v33  ;;  %v4031_v49 = vpop.f32.mrb[55].mxu0  ;;  %v1988_v40 = vadd.f32 %v1987_v47, %v4187_v36  ;;  %2664 = vmatprep.subr.bf16.mxu1 %v2216_v28  ;;  %v2147_v0 = vmax.f32 %v1985_v5, 0.0  ;;  %v4188_v5 = vld [vmem:[#allocation6_spill] sm:$0xff] }
 0x14a   :  { %v2150_v3 = vmax.f32 %v1996_v27, 0.0  ;;  %v2110_v59 = vmax.f32 %v1836_v16, 0.0 }
 0x14b   :  { %v2109_v41 = vmax.f32 %v1833_v7, 0.0  ;;  %2654 = vmatprep.subr.bf16.mxu0 %v2206_v56  ;;  %v2148_v6 = vmax.f32 %v1988_v40, 0.0  ;;  %v1483_v34 = vpop.permute.xlu1 %1482  ;;  %v2566_v56 = vcombine.low %v4188_v5, %v4188_v5  ;;  %v2571_v7 = vcombine.high %v4037_v2, %v4037_v2 }
 0x14c   :  { %v2218_v20 = vpack.c.bf16 %v2150_v3, %v2149_v57  ;;  %v1478_v60 = vpop.permute.xlu0 %1477  ;;  %2665 = vmatpush3.bf16.msra.mxu1 %v3939_v19  ;;  %v4040_v27 = vpop.f32.mrb[56].mxu0 }
 0x14d   :  { %v2198_v11 = vpack.c.bf16 %v2110_v59, %v2109_v41  ;;  %v2854_v43 = vpop.f32.mrb[56].mxu1  ;;  %v2217_v28 = vpack.c.bf16 %v2148_v6, %v2147_v0  ;;  %v4045_v17 = vpop.f32.mrb[57].mxu0 }
 0x14e   :  { %v2009_v15 = vadd.f32 %v2854_v43, %v3963_v62  ;;  %v2000_v33 = vpop.f32.mrb[57].mxu1  ;;  %v4047_v32 = vpop.f32.mrb[58].mxu0 }
 0x14f   :  { %v2855_v16 = vpop.f32.mrb[58].mxu1  ;;  %2655 = vmatpush3.bf16.msra.mxu0 %v2198_v11  ;;  %v2001_v19 = vadd.f32 %v2000_v33, %v3921_v58  ;;  %2666 = vmatprep.subr.bf16.mxu1 %v2217_v28  ;;  %v1403_v57 = vpop.permute.xlu1 %1402  ;;  %v4189_v11 = vld [vmem:[#allocation10_spill] sm:$0xff] }
 0x150   :  { %v2012_v47 = vadd.f32 %v2855_v16, %v3961_v44  ;;  %v1398_v62 = vpop.permute.xlu0 %1397  ;;  %2684 = vmatprep.subr.bf16.mxu0 %v3866_v10  ;;  %v1964_v3 = vadd.f32 %v3991_v35, %v1403_v57  ;;  %v2003_v40 = vpop.f32.mrb[59].mxu1  ;;  %2667 = vmatpush3.bf16.msra.mxu1 %v3971_v1  ;;  %v2153_v41 = vmax.f32 %v2009_v15, 0.0 }
 0x151   :  { %v1961_v36 = vadd.f32 %v3983_v12, %v1398_v62  ;;  %v4057_v59 = vpop.f32.mrb[59].mxu0  ;;  %v2004_v58 = vadd.f32 %v2003_v40, %v3919_v22  ;;  %2668 = vmatprep.subr.bf16.mxu1 %v2218_v20  ;;  %v2151_v10 = vmax.f32 %v2001_v19, 0.0 }
 0x152   :  { %v2154_v0 = vmax.f32 %v2012_v47, 0.0  ;;  %2274 = vmatmul.mubr.bf16.vlgmr.msra.gmra.mrb[64].mxu0 %v2566_v56  ;;  %v2142_v44 = vmax.f32 %v1964_v3, 0.0 }
 0x153   :  { %v2141_v6 = vmax.f32 %v1961_v36, 0.0  ;;  %2685 = vmatpush3.bf16.msra.mxu0 %v4189_v11  ;;  %2367 = vmatprep.mubr.bf16.mxu0 %v2571_v7  ;;  %v2152_v43 = vmax.f32 %v2004_v58, 0.0  ;;  %v415_v12 = vpop.permute.xlu1 %414  ;;  %v4191_v11 = vld [vmem:[#allocation14_spill] sm:$0xff] }
 0x154   :  { %v2220_v35 = vpack.c.bf16 %v2154_v0, %v2153_v41  ;;  %v410_v28 = vpop.permute.xlu0 %409  ;;  %2686 = vmatprep.subr.bf16.mxu0 %v3864_v37  ;;  %v978_v22 = vadd.f32 %v4012_v14, %v415_v12  ;;  %2669 = vmatpush3.bf16.msra.mxu1 %v3959_v21  ;;  %v4067_v33 = vpop.f32.mrb[60].mxu0  ;;  %v4190_v37 = vld [vmem:[#allocation9_spill] sm:$0xff] }
 0x155   :  { %v4062_v1 = vpack.c.bf16 %v2142_v44, %v2141_v6  ;;  %v975_v15 = vadd.f32 %v4006_v38, %v410_v28  ;;  %v2858_v20 = vpop.f32.mrb[60].mxu1  ;;  %v2219_v5 = vpack.c.bf16 %v2152_v43, %v2151_v10  ;;  %v4069_v7 = vpop.f32.mrb[61].mxu0 }
 0x156   :  { %v2025_v56 = vadd.f32 %v2858_v20, %v1478_v60  ;;  %v2016_v16 = vpop.f32.mrb[61].mxu1  ;;  %v2080_v47 = vmax.f32 %v978_v22, 0.0  ;;  %v4072_v62 = vpop.f32.mrb[62].mxu0  ;;  %v4192_v22 = vld [vmem:[#allocation11_spill] sm:$0xff] }
 0x157   :  { %v2079_v19 = vmax.f32 %v975_v15, 0.0  ;;  %v2859_v57 = vpop.f32.mrb[62].mxu1  ;;  %2687 = vmatpush3.bf16.msra.mxu0 %v4190_v37  ;;  %v2017_v38 = vadd.f32 %v2016_v16, %v4001_v26  ;;  %2670 = vmatprep.subr.bf16.mxu1 %v2219_v5  ;;  %v425_v21 = vpop.permute.xlu1 %424 }
 0x158   :  { %v2028_v14 = vadd.f32 %v2859_v57, %v1483_v34  ;;  %v420_v3 = vpop.permute.xlu0 %419  ;;  %2688 = vmatprep.subr.bf16.mxu0 %v3886_v39  ;;  %v986_v60 = vadd.f32 %v4008_v51, %v425_v21  ;;  %v2019_v41 = vpop.f32.mrb[63].mxu1  ;;  %2671 = vmatpush3.bf16.msra.mxu1 %v3987_v13  ;;  %v2157_v58 = vmax.f32 %v2025_v56, 0.0 }
 0x159   :  { %v2183_v36 = vpack.c.bf16 %v2080_v47, %v2079_v19  ;;  %v983_v40 = vadd.f32 %v4003_v9, %v420_v3  ;;  %v4079_v0 = vpop.f32.mrb[63].mxu0  ;;  %v2020_v26 = vadd.f32 %v2019_v41, %v3999_v29  ;;  %2672 = vmatprep.subr.bf16.mxu1 %v2220_v35  ;;  %v2155_v39 = vmax.f32 %v2017_v38, 0.0  ;;  %v4193_v19 = vld [vmem:[#allocation17_spill] sm:$0xff]  ;;  %v4194_v3 = vld [vmem:[#allocation15_spill] sm:$0xff]  ;;  %v4195_v41 = vld [vmem:[#allocation22_spill] sm:$0xff] }
 0x15a   :  { %v2158_v44 = vmax.f32 %v2028_v14, 0.0  ;;  %v2082_v34 = vmax.f32 %v986_v60, 0.0 }
 0x15b   :  { %v2081_v6 = vmax.f32 %v983_v40, 0.0  ;;  %2689 = vmatpush3.bf16.msra.mxu0 %v4191_v11  ;;  %v2156_v43 = vmax.f32 %v2020_v26, 0.0  ;;  %v435_v51 = vpop.permute.xlu1 %434 }
 0x15c   :  { %v2222_v10 = vpack.c.bf16 %v2158_v44, %v2157_v58  ;;  %v430_v12 = vpop.permute.xlu0 %429  ;;  %2690 = vmatprep.subr.bf16.mxu0 %v3877_v4  ;;  %v994_v28 = vadd.f32 %v4031_v49, %v435_v51  ;;  %2673 = vmatpush3.bf16.msra.mxu1 %v3979_v46  ;;  %v4095_v46 = vld [vmem:[%s4153_s6 + $0x8] sm:$0xff]  ;;  %s2963_s6 = smov [#allocation2]  }
 0x15d   :  { %v2184_v9 = vpack.c.bf16 %v2082_v34, %v2081_v6  ;;  %v991_v13 = vadd.f32 %v4022_v42, %v430_v12  ;;  %v2221_v29 = vpack.c.bf16 %v2156_v43, %v2155_v39  ;;  %v2573_v38 = vcombine.high %v4095_v46, %v4095_v46  ;;  %v4196_v6 = vld [vmem:[#allocation20_spill] sm:$0xff] }
 0x15e   :  { %v2084_v15 = vmax.f32 %v994_v28, 0.0 }
 0x15f   :  { %v2083_v35 = vmax.f32 %v991_v13, 0.0  ;;  %2691 = vmatpush3.bf16.msra.mxu0 %v4192_v22  ;;  %2674 = vmatprep.subr.bf16.mxu1 %v2221_v29  ;;  %v445_v20 = vpop.permute.xlu1 %444 }
 0x160   :  { %v440_v5 = vpop.permute.xlu0 %439  ;;  %2692 = vmatprep.subr.bf16.mxu0 %v3903_v24  ;;  %v1002_v4 = vadd.f32 %v4024_v48, %v445_v20  ;;  %2675 = vmatpush3.bf16.msra.mxu1 %v4015_v63  ;;  %v2937_v24 = vld [vmem:[%s4154_s7 + $0x8] sm:$0xff]  ;;  %s2430_s7 = sshll.u32 %s2963_s6, 4  ;;  %s2431_s7 = int_to_ptr.vmem [resolvable:$true] %s2430_s7 }
 0x161   :  { %v2185_v56 = vpack.c.bf16 %v2084_v15, %v2083_v35  ;;  %v999_v16 = vadd.f32 %v4019_v23, %v440_v5  ;;  %2676 = vmatprep.subr.bf16.mxu1 %v2222_v10  ;;  %v2568_v23 = vcombine.low %v2937_v24, %v2937_v24  ;;  %v4197_v35 = vld [vmem:[#allocation23_spill] sm:$0xff]  ;;  %s2938_s5 = scalar_lea.vmem %s2431_s7, 128  ;;  %p2943_p1 = scmp.lt.s32.totalorder %s2431_s7, %s2431_s7 }
 0x162   :  { %v2086_v42 = vmax.f32 %v1002_v4, 0.0  ;;  %p2939_p0 = scmp.ne.s32.totalorder %s2431_s7, %s2938_s5  ;;  %p2944_p2 = scmp.lt.s32.totalorder %s2938_s5, %s2938_s5 }
 0x163   :  { %v2085_v49 = vmax.f32 %v999_v16, 0.0  ;;  %2693 = vmatpush3.bf16.msra.mxu0 %v4193_v19  ;;  %v455_v47 = vpop.permute.xlu1 %454  ;;  %v4198_v19 = vld [vmem:[#allocation24_spill] sm:$0xff] }
 0x164   :  { %v450_v57 = vpop.permute.xlu0 %449  ;;  %2694 = vmatprep.subr.bf16.mxu0 %v3899_v18  ;;  %v1010_v37 = vadd.f32 %v4057_v59, %v455_v47  ;;  %2677 = vmatpush3.bf16.msra.mxu1 %v4062_v1  ;;  %p2945_p3 = por %p2944_p2, %p2943_p1 }
 0x165   :  { %v2186_v63 = vpack.c.bf16 %v2086_v42, %v2085_v49  ;;  %v1007_v48 = vadd.f32 %v4045_v17, %v450_v57  ;;  %2706 = vmatprep.subr.bf16.mxu1 %v2183_v36  ;;  %v4199_v57 = vld [vmem:[#allocation5_spill] sm:$0xff] }
 0x166   :  { %v2088_v21 = vmax.f32 %v1010_v37, 0.0  ;;  %p2946_p4 = pnand %p2945_p3, %p2939_p0 }
 0x167   :  { %v2087_v14 = vmax.f32 %v1007_v48, 0.0  ;;  %2695 = vmatpush3.bf16.msra.mxu0 %v4194_v3  ;;  %v375_v18 = vpop.permute.xlu1 %374  ;;  %2314 = vmatmul.mubr.bf16.vlgmr.msra.gmra.mrb[64].mxu1 %v2568_v23 }
 0x168   :  { %v370_v60 = vpop.permute.xlu0 %369  ;;  %2696 = vmatprep.subr.bf16.mxu0 %v3923_v61  ;;  %v946_v17 = vadd.f32 %v3976_v25, %v375_v18  ;;  %2707 = vmatpush3.bf16.msra.mxu1 %v3943_v50  ;;  %v2570_v50 = vcombine.low %v4037_v2, %v4037_v2 }
 0x169   :  { %v2187_v40 = vpack.c.bf16 %v2088_v21, %v2087_v14  ;;  %v943_v59 = vadd.f32 %v3969_v8, %v370_v60  ;;  %2407 = vmatprep.mubr.bf16.mxu1 %v2573_v38  ;;  %2708 = vmatprep.subr.bf16.mxu1 %v2184_v9 }
 0x16a   :  { %v2072_v1 = vmax.f32 %v946_v17, 0.0 }
 0x16b   :  { %v2071_v36 = vmax.f32 %v943_v59, 0.0  ;;  %2697 = vmatpush3.bf16.msra.mxu0 %v4195_v41  ;;  %v465_v58 = vpop.permute.xlu1 %464 }
 0x16c   :  { %v460_v44 = vpop.permute.xlu0 %459  ;;  %2698 = vmatprep.subr.bf16.mxu0 %v3917_v54  ;;  %v1018_v61 = vadd.f32 %v4047_v32, %v465_v58  ;;  %2709 = vmatpush3.bf16.msra.mxu1 %v3937_v45 }
 0x16d   :  { %v2179_v26 = vpack.c.bf16 %v2072_v1, %v2071_v36  ;;  %v1015_v34 = vadd.f32 %v4040_v27, %v460_v44  ;;  %2710 = vmatprep.subr.bf16.mxu1 %v2185_v56 }
 0x16e   :  { %v2090_v8 = vmax.f32 %v1018_v61, 0.0 }
 0x16f   :  { %v2089_v25 = vmax.f32 %v1015_v34, 0.0  ;;  %2699 = vmatpush3.bf16.msra.mxu0 %v4196_v6  ;;  %v385_v11 = vpop.permute.xlu1 %384 }
 0x170   :  { %v380_v39 = vpop.permute.xlu0 %379  ;;  %v954_v54 = vadd.f32 %v3973_v53, %v385_v11  ;;  %2711 = vmatpush3.bf16.msra.mxu1 %v3967_v31 }
 0x171   :  { %v2188_v10 = vpack.c.bf16 %v2090_v8, %v2089_v25  ;;  %v951_v43 = vadd.f32 %v3965_v55, %v380_v39  ;;  %2712 = vmatprep.subr.bf16.mxu1 %v2186_v63 }
 0x172   :  { %2368 = vmatmul.mubr.bf16.vlgmr.msra.gmra.mrb[68].mxu0 %v2570_v50  ;;  %v2074_v45 = vmax.f32 %v954_v54, 0.0 }
 0x173   :  { %v2073_v27 = vmax.f32 %v951_v43, 0.0  ;;  %v475_v32 = vpop.permute.xlu1 %474 }
 0x174   :  { %v470_v51 = vpop.permute.xlu0 %469  ;;  %v1026_v9 = vadd.f32 %v4079_v0, %v475_v32  ;;  %2713 = vmatpush3.bf16.msra.mxu1 %v3957_v52 }
 0x175   :  { %v2180_v2 = vpack.c.bf16 %v2074_v45, %v2073_v27  ;;  %v1023_v12 = vadd.f32 %v4069_v7, %v470_v51  ;;  %2714 = vmatprep.subr.bf16.mxu1 %v2187_v40 }
 0x176   :  { %v2092_v53 = vmax.f32 %v1026_v9, 0.0 }
 0x177   :  { %v2091_v13 = vmax.f32 %v1023_v12, 0.0  ;;  %v395_v28 = vpop.permute.xlu1 %394 }
 0x178   :  { %v390_v55 = vpop.permute.xlu0 %389  ;;  %v962_v31 = vadd.f32 %v3997_v30, %v395_v28  ;;  %2715 = vmatpush3.bf16.msra.mxu1 %v2179_v26 }
 0x179   :  { %v2189_v29 = vpack.c.bf16 %v2092_v53, %v2091_v13  ;;  %v959_v15 = vadd.f32 %v4197_v35, %v390_v55  ;;  %2716 = vmatprep.subr.bf16.mxu1 %v2188_v10 }
 0x17a   :  { %v2076_v22 = vmax.f32 %v962_v31, 0.0 }
 0x17b   :  { %v2075_v20 = vmax.f32 %v959_v15, 0.0  ;;  %v485_v5 = vpop.permute.xlu1 %484 }
 0x17c   :  { %v480_v7 = vpop.permute.xlu0 %479  ;;  %v1034_v0 = vadd.f32 %v4072_v62, %v485_v5  ;;  %2717 = vmatpush3.bf16.msra.mxu1 %v2180_v2  ;;  %v2572_v62 = vcombine.low %v4095_v46, %v4095_v46 }
 0x17d   :  { %v2181_v56 = vpack.c.bf16 %v2076_v22, %v2075_v20  ;;  %v1031_v52 = vadd.f32 %v4067_v33, %v480_v7  ;;  %2718 = vmatprep.subr.bf16.mxu1 %v2189_v29 }
 0x17e   :  { %v2094_v4 = vmax.f32 %v1034_v0, 0.0 }
 0x17f   :  { %v2093_v16 = vmax.f32 %v1031_v52, 0.0  ;;  %v405_v42 = vpop.permute.xlu1 %404 }
 0x180   :  { %v400_v49 = vpop.permute.xlu0 %399  ;;  %v970_v47 = vadd.f32 %v4198_v19, %v405_v42  ;;  %2719 = vmatpush3.bf16.msra.mxu1 %v2181_v56 }
 0x181   :  { %v2190_v30 = vpack.c.bf16 %v2094_v4, %v2093_v16  ;;  %v967_v24 = vadd.f32 %v4199_v57, %v400_v49 }
 0x182   :  { %v2078_v23 = vmax.f32 %v970_v47, 0.0 }
 0x183   :  { %v2077_v63 = vmax.f32 %v967_v24, 0.0  ;;  %2720 = vmatprep.subr.bf16.mxu1 %v2190_v30 }
 0x184   :  { %v2419_v6 = vpop.permute.xlu0 %2418 }
 0x185   :  { %v2182_v48 = vpack.c.bf16 %v2078_v23, %v2077_v63 }
 0x187   :  { %2721 = vmatpush3.bf16.msra.mxu1 %v2182_v48 }
 0x18a   :  { %2408 = vmatmul.mubr.bf16.vlgmr.msra.gmra.mrb[68].mxu1 %v2572_v62 }
 0x225   :  { %v2656_v33 = vpop.f32.mrb[64].mxu0 }
 0x226   :  { %v2657_v37 = vpop.f32.mrb[65].mxu0 }
 0x227   :  { %v2658_v38 = vadd.f32 %v2657_v37, %v2656_v33  ;;  %v2659_v14 = vpop.f32.mrb[66].mxu0 }
 0x228   :  { %v2660_v21 = vpop.f32.mrb[67].mxu0 }
 0x23a   :  { %v2678_v3 = vpop.f32.mrb[64].mxu1 }
 0x23b   :  { %v2679_v18 = vpop.f32.mrb[65].mxu1 }
 0x23c   :  { %v2680_v60 = vadd.f32 %v2679_v18, %v2678_v3  ;;  %v2681_v40 = vpop.f32.mrb[66].mxu1 }
 0x23d   :  { %v2682_v17 = vpop.f32.mrb[67].mxu1 }
 0x23e   :  { %v2316_v59 = vadd.f32 %v2680_v60, %v2658_v38 }
 0x245   :  { %v2700_v1 = vpop.f32.mrb[68].mxu0 }
 0x246   :  { %v2701_v36 = vpop.f32.mrb[69].mxu0 }
 0x247   :  { %v2702_v41 = vadd.f32 %v2701_v36, %v2700_v1  ;;  %v2703_v58 = vpop.f32.mrb[70].mxu0 }
 0x248   :  { %v2704_v44 = vpop.f32.mrb[71].mxu0 }
 0x249   :  { %v2370_v26 = vadd.f32 %v2702_v41, %v2316_v59 }
 0x25d   :  { %v2722_v46 = vpop.f32.mrb[68].mxu1 }
 0x25e   :  { %v2723_v61 = vpop.f32.mrb[69].mxu1 }
 0x25f   :  { %v2724_v34 = vadd.f32 %v2723_v61, %v2722_v46  ;;  %v2725_v50 = vpop.f32.mrb[70].mxu1 }
 0x260   :  { %v2726_v8 = vpop.f32.mrb[71].mxu1 }
 0x261   :  { %v2410_v25 = vadd.f32 %v2724_v34, %v2370_v26 }
 0x263   :  { %v2421_v11 = vadd.f32 %v2419_v6, %v2410_v25 }
 0x265   :  { %v2422_v39 = vmax.f32 %v2421_v11, 0.0 }
 0x267   :  { %2423 = vst.msk [vmem:[#allocation2] sm:$0xff] %vm647_vm2, %v2422_v39 }
 0x268   :  { %2949 = shalt.err (!%p2946_p4)
}
 0x269   :  { %s2950_s27 = scalar_lea.hbm %s4156_s9, 128 }
 0x26a   :  { %p2951_p5 = scmp.ne.s32.totalorder %s4156_s9, %s2950_s27  ;;  %p2954_p6 = scmp.lt.u32.totalorder %s2950_s27, %s4156_s9 }
 0x26c   :  { %p2956_p7 = pnand %p2954_p6, %p2951_p5 }
 0x26e   :  { %2959 = shalt.err (!%p2956_p7)
}
 0x26f   :  { %2433 = dma.vmem_to_hbm [thread:$0]  %s2431_s7, 128, %s4156_s9, [#allocation3]  }
 0x270   :  { %2960 = dma.done.wait [#allocation3], 128  }
 0x271   :  { %2961 = vsyncadd [#allocation3], 4294967168 }
 0x272   :  { %2437 = vsyncpa [#allocation3], 1 }

</bundles_post_ra>
